<compile_context>
chip_gen: v7x
topology: tpu7x:2x2x1
jax: 0.10.0
libtpu: 0.0.40
codegen_flags: <defaults>
</compile_context>

<pallas_src>
import functools
import math

import jax
import jax.numpy as jnp
import numpy as np
from jax.experimental import pallas as pl
from jax.experimental.pallas import tpu as pltpu

_SQRT2_INV = 1.0 / math.sqrt(2.0)


# ----------------------------------------------------------------------------
# Small helpers
# ----------------------------------------------------------------------------
def _cdiv(a, b):
    return (a + b - 1) // b


def _round_up(v, m):
    return _cdiv(v, m) * m


def _pad_to(a, shape, dtype):
    """Cast `a` (2-D) to `dtype` and zero-pad up to `shape` (no-op if already there)."""
    a = a.astype(dtype)
    if tuple(a.shape) == tuple(shape):
        return a
    return jnp.zeros(shape, dtype).at[: a.shape[0], : a.shape[1]].set(a)


# ----------------------------------------------------------------------------
# Pallas kernel: one (row_tile, hidden_chunk) step of the fused MLP
# ----------------------------------------------------------------------------
def _mlp_kernel(x_ref, w1_ref, b1_ref, w2_ref, b2_ref, o_ref, acc_ref, *,
                approximate_gelu):
    k = pl.program_id(1)

    @pl.when(k == 0)
    def _init():
        acc_ref[...] = jnp.zeros_like(acc_ref)

    # fc1 (+ bias) on this hidden chunk.  MXU operands arrive already in their
    # compute dtype (bf16 or f32); accumulation is f32.
    h = jnp.dot(x_ref[...], w1_ref[...], preferred_element_type=jnp.float32)
    h = h + b1_ref[...]                      # b1 kept in f32

    if approximate_gelu:
        # tanh-approx GELU: transcendental lands on the EUP slot (free vs. VALU).
        h = jax.nn.gelu(h, approximate=True)
    else:
        # Exact erf GELU -- matches torch.nn.GELU() default (approximate='none').
        h = 0.5 * h * (1.0 + jax.lax.erf(h * jnp.float32(_SQRT2_INV)))

    # Dropout(p=0.0) is identity (inference path).
    # fc2 on this hidden chunk, accumulated in f32 VMEM scratch.  The astype is a
    # no-op in the f32 path and the (intentional) activation downcast in bf16 mode.
    acc_ref[...] += jnp.dot(h.astype(w2_ref.dtype), w2_ref[...],
                            preferred_element_type=jnp.float32)

    @pl.when(k == pl.num_programs(1) - 1)
    def _finalize():
        o_ref[...] = (acc_ref[...] + b2_ref[...]).astype(o_ref.dtype)


# ----------------------------------------------------------------------------
# One-time parameter preparation (padding + dtype, done ONCE per model, not per call)
# ----------------------------------------------------------------------------
def prepare_mlp_params(w1, b1, w2, b2, *, compute_dtype=jnp.float32,
                       max_hid_tile=2048):
    """Pad feature dims to multiples of 128 (lane-dense, MXU-shaped), choose the
    hidden-dim chunking, and cast weights once to `compute_dtype` (bf16 halves DMA
    and resident VMEM).  Biases stay f32 (negligible traffic, better numerics).
    Zero padding is exact: padded b1 = 0, GELU(0) = 0, padded W2 rows = 0."""
    compute_dtype = jnp.dtype(compute_dtype)
    in_f, hid_f = w1.shape
    hid_f2, out_f = w2.shape
    assert hid_f == hid_f2 and b1.shape == (hid_f,) and b2.shape == (out_f,)

    in_p = _round_up(in_f, 128)
    out_p = _round_up(out_f, 128)
    hid_p = _round_up(hid_f, 128)

    # Hidden-dim chunking (reduction grid axis): bounds resident weight VMEM to
    # (in_p + out_p) * hid_tile instead of in_p*hid_p + hid_p*out_p, which is what
    # keeps transformer-scale widths inside v7x's 64 MiB per-TC VMEM.
    max_hid_tile = _round_up(max(128, int(max_hid_tile)), 128)
    n_hid = _cdiv(hid_p, max_hid_tile)
    hid_tile = _round_up(_cdiv(hid_p, n_hid), 128)
    hid_p = hid_tile * n_hid

    return dict(
        w1=_pad_to(w1, (in_p, hid_p), compute_dtype),
        b1=_pad_to(b1.reshape(1, -1), (1, hid_p), jnp.float32),
        w2=_pad_to(w2, (hid_p, out_p), compute_dtype),
        b2=_pad_to(b2.reshape(1, -1), (1, out_p), jnp.float32),
        in_f=in_f, hid_f=hid_f, out_f=out_f,
        in_p=in_p, hid_p=hid_p, out_p=out_p,
        hid_tile=hid_tile, n_hid=n_hid,
        compute_dtype=compute_dtype,
    )


# ----------------------------------------------------------------------------
# Fused MLP forward
# ----------------------------------------------------------------------------
def mlp_pallas(x, params, *, row_tile=256, out_dtype=None,
               approximate_gelu=False, single_buffer_weights=None):
    """x: (..., in_features).  `params` from prepare_mlp_params."""
    compute_dtype = params["compute_dtype"]
    in_f, out_f = params["in_f"], params["out_f"]
    in_p, out_p = params["in_p"], params["out_p"]
    hid_tile, n_hid = params["hid_tile"], params["n_hid"]

    orig_shape = x.shape
    assert orig_shape[-1] == in_f
    out_dtype = jnp.dtype(out_dtype) if out_dtype is not None else x.dtype

    x2d = x.reshape(-1, in_f)
    if x2d.dtype != compute_dtype:
        x2d = x2d.astype(compute_dtype)        # once, outside the grid loop
    n_rows = x2d.shape[0]

    # Sublane packing: 16-row granularity for 16-bit x/out tiles, 8 for f32.
    sub = 16 if (compute_dtype.itemsize == 2 or out_dtype.itemsize == 2) else 8
    row_tile = max(sub, min(_round_up(row_tile, sub), _round_up(n_rows, sub)))
    rows_p = _round_up(n_rows, row_tile)
    xp = _pad_to(x2d, (rows_p, in_p), compute_dtype)   # no-op copy if already aligned

    # --- Buffering policy & VMEM budget ------------------------------------
    wbytes = compute_dtype.itemsize
    resident_w = (in_p * hid_tile + hid_tile * out_p) * wbytes
    if single_buffer_weights is None:
        # Single-buffer the grid-constant weight blocks only when they are big
        # enough to matter (default double-buffering would hold 2x the weight
        # footprint -- critical on v7x's 64 MiB per-TC VMEM, and doubled again
        # across the two cores under "parallel" semantics).  Tiny weights keep
        # the default; it costs nothing.
        single_buffer_weights = (n_hid == 1) and resident_w > (2 << 20)
    single_buffer_weights = bool(single_buffer_weights) and (n_hid == 1)
    w_buf = 1 if single_buffer_weights else 2

    vmem_needed = (
        2 * row_tile * in_p * wbytes                       # x tile (double-buffered)
        + 2 * row_tile * out_p * out_dtype.itemsize        # out tile
        + row_tile * out_p * 4                             # f32 accumulator scratch
        + w_buf * resident_w                               # W1/W2 chunks
        + w_buf * hid_tile * 4 + 2 * out_p * 4             # f32 biases
    )
    # v5e's default scoped limit (~16 MiB) is too small at modest widths; clamp to
    # something sane.  (On v7x the physical per-TC budget is 64 MiB -- the hidden
    # chunking above is what keeps `vmem_needed` below it.)
    vmem_limit = int(min(max(vmem_needed * 3 // 2 + (4 << 20), 32 << 20), 128 << 20))

    def wspec(shape, index_map):
        if single_buffer_weights:
            return pl.BlockSpec(shape, index_map, pipeline_mode=pl.Buffered(1))
        return pl.BlockSpec(shape, index_map)

    grid = (rows_p // row_tile, n_hid)

    out = pl.pallas_call(
        functools.partial(_mlp_kernel, approximate_gelu=approximate_gelu),
        out_shape=jax.ShapeDtypeStruct((rows_p, out_p), out_dtype),
        grid=grid,
        in_specs=[
            pl.BlockSpec((row_tile, in_p), lambda i, k: (i, 0)),   # x row tile
            wspec((in_p, hid_tile), lambda i, k: (0, k)),          # fc1 weight chunk
            wspec((1, hid_tile), lambda i, k: (0, k)),             # fc1 bias chunk
            wspec((hid_tile, out_p), lambda i, k: (k, 0)),         # fc2 weight chunk
            wspec((1, out_p), lambda i, k: (0, 0)),                # fc2 bias
        ],
        out_specs=pl.BlockSpec((row_tile, out_p), lambda i, k: (i, 0)),
        scratch_shapes=[pltpu.VMEM((row_tile, out_p), jnp.float32)],
        compiler_params=pltpu.CompilerParams(
            dimension_semantics=("parallel", "arbitrary"),
            vmem_limit_bytes=vmem_limit),
    )(xp, params["w1"], params["b1"], params["w2"], params["b2"])

    return out[:n_rows, :out_f].reshape(orig_shape[:-1] + (out_f,))


# ----------------------------------------------------------------------------
# Pure-JAX reference (mirrors the PyTorch Mlp forward; dropout p=0 -> identity)
# ----------------------------------------------------------------------------
def mlp_reference(x, w1, b1, w2, b2):
    h = x @ w1 + b1
    h = 0.5 * h * (1.0 + jax.lax.erf(h * jnp.float32(_SQRT2_INV)))
    return h @ w2 + b2


# ----------------------------------------------------------------------------
# Main
# ----------------------------------------------------------------------------
if __name__ == "__main__":
    key = jax.random.PRNGKey(0)

    def make_params(k, in_f, hid_f, out_f):
        k1, k2, k3, k4 = jax.random.split(k, 4)
        lim1 = 1.0 / math.sqrt(in_f)
        lim2 = 1.0 / math.sqrt(hid_f)
        w1 = jax.random.uniform(k1, (in_f, hid_f), jnp.float32, -lim1, lim1)
        b1 = jax.random.uniform(k2, (hid_f,), jnp.float32, -lim1, lim1)
        w2 = jax.random.uniform(k3, (hid_f, out_f), jnp.float32, -lim2, lim2)
        b2 = jax.random.uniform(k4, (out_f,), jnp.float32, -lim2, lim2)
        return w1, b1, w2, b2

    ok = True

    # ---- Case A: lane-aligned shapes (batch=2, seq=128, d=128, hidden=512) ----
    kx, kp, key = jax.random.split(key, 3)
    in_f, hid_f, out_f = 128, 512, 128
    x = jax.random.normal(kx, (2, 128, in_f), jnp.float32)
    w1, b1, w2, b2 = make_params(kp, in_f, hid_f, out_f)
    ref = mlp_reference(x.reshape(-1, in_f), w1, b1, w2, b2).reshape(2, 128, out_f)

    p_f32 = prepare_mlp_params(w1, b1, w2, b2, compute_dtype=jnp.float32)
    p_bf16 = prepare_mlp_params(w1, b1, w2, b2, compute_dtype=jnp.bfloat16)

    y_f32 = jax.block_until_ready(mlp_pallas(x, p_f32, row_tile=256))
    y_bf16 = jax.block_until_ready(
        mlp_pallas(x, p_bf16, row_tile=256, out_dtype=jnp.bfloat16))
    y_tanh = jax.block_until_ready(
        mlp_pallas(x, p_f32, row_tile=256, approximate_gelu=True))

    e_f32 = float(jnp.max(jnp.abs(y_f32 - ref)))
    e_bf16 = float(jnp.max(jnp.abs(y_bf16.astype(jnp.float32) - ref)))
    e_tanh = float(jnp.max(jnp.abs(y_tanh - ref)))
    ok &= (y_f32.shape == ref.shape) and np.isfinite(e_f32) and (e_f32 < 2e-2)
    ok &= np.isfinite(e_bf16) and (e_bf16 < 1e-1)      # bf16 operands + bf16 output (intentional)
    ok &= np.isfinite(e_tanh) and (e_tanh < 6e-2)      # tanh-approx GELU drift (intentional)

    # ---- Case B: ragged, non-128-aligned shapes (exercises the padding path) ----
    kx2, kp2, key = jax.random.split(key, 3)
    in_f2, hid_f2, out_f2 = 96, 200, 80
    x2 = jax.random.normal(kx2, (3, 17, in_f2), jnp.float32)
    w1b, b1b, w2b, b2b = make_params(kp2, in_f2, hid_f2, out_f2)
    ref2 = mlp_reference(x2.reshape(-1, in_f2), w1b, b1b, w2b, b2b).reshape(3, 17, out_f2)
    p2 = prepare_mlp_params(w1b, b1b, w2b, b2b, compute_dtype=jnp.float32)
    y2 = jax.block_until_ready(mlp_pallas(x2, p2))
    e2 = float(jnp.max(jnp.abs(y2 - ref2)))
    ok &= (y2.shape == ref2.shape) and np.isfinite(e2) and (e2 < 2e-2)

    # TODO(synk): stochastic dropout (p>0, training mode) is not implemented; the
    # module defaults (p=0.0) make it an identity, which is what the kernel computes.

    if ok:
        print("KERNEL_OK")
    else:
        print(f"MISMATCH e_f32={e_f32} e_bf16={e_bf16} e_tanh={e_tanh} e2={e2}")
</pallas_src>

<mosaic_0001>
module attributes {stable_mosaic.version = 11 : i64} {
  func.func @_mlp_kernel(%arg0: i32, %arg1: i32, %arg2: memref<256x128xf32, #tpu.memory_space<vmem>>, %arg3: memref<128x512xf32, #tpu.memory_space<vmem>>, %arg4: memref<1x512xf32, #tpu.memory_space<vmem>>, %arg5: memref<512x128xf32, #tpu.memory_space<vmem>>, %arg6: memref<1x128xf32, #tpu.memory_space<vmem>>, %arg7: memref<256x128xf32, #tpu.memory_space<vmem>>, %arg8: memref<256x128xf32, #tpu.memory_space<vmem>>) attributes {dimension_semantics = [#tpu.dimension_semantics<parallel>, #tpu.dimension_semantics<arbitrary>], iteration_bounds = array<i64: 1, 1>, scalar_prefetch = 0 : i64, scratch_operands = 1 : i64, tpu.core_type = #tpu.core_type<tc>, window_params = [{transform_indices = @transform_0, window_bounds = array<i64: 256, 128>}, {transform_indices = @transform_1, window_bounds = array<i64: 128, 512>}, {transform_indices = @transform_2, window_bounds = array<i64: 1, 512>}, {transform_indices = @transform_3, window_bounds = array<i64: 512, 128>}, {pipeline_mode = #tpu.pipeline_mode<synchronous>, transform_indices = @transform_4, window_bounds = array<i64: 1, 128>}, {transform_indices = @transform_5, window_bounds = array<i64: 256, 128>}]} {
    %c0_i32 = arith.constant 0 : i32
    %0 = arith.cmpi eq, %arg1, %c0_i32 : i32
    %1 = arith.extui %0 : i1 to i32
    %c0_i32_0 = arith.constant 0 : i32
    %2 = arith.cmpi ne, %1, %c0_i32_0 : i32
    scf.if %2 {
      %cst_18 = arith.constant 0.000000e+00 : f32
      %25 = vector.broadcast %cst_18 : f32 to vector<256x128xf32>
      %c0_19 = arith.constant 0 : index
      %c0_20 = arith.constant 0 : index
      %26 = vector.load %arg8[%c0_19, %c0_20] : memref<256x128xf32, #tpu.memory_space<vmem>>, vector<256x128xf32>
      tpu.vector_store %arg8[%c0_19, %c0_20], %25 {strides = array<i32>} : memref<256x128xf32, #tpu.memory_space<vmem>>, vector<256x128xf32>,
    } else {
    }
    %c0 = arith.constant 0 : index
    %c0_1 = arith.constant 0 : index
    %3 = vector.load %arg2[%c0, %c0_1] : memref<256x128xf32, #tpu.memory_space<vmem>>, vector<256x128xf32>
    %c0_2 = arith.constant 0 : index
    %c0_3 = arith.constant 0 : index
    %4 = vector.load %arg3[%c0_2, %c0_3] : memref<128x512xf32, #tpu.memory_space<vmem>>, vector<128x512xf32>
    %cst = arith.constant dense<0.000000e+00> : vector<256x512xf32>
    %5 = tpu.matmul %3, %4, %cst {dimension_numbers = #tpu.dot_dimension_numbers<[1], [0], [0], [1], [0, 0, 1, 1], [], []>} : vector<256x128xf32>, vector<128x512xf32>, vector<256x512xf32> -> vector<256x512xf32>
    %c0_4 = arith.constant 0 : index
    %c0_5 = arith.constant 0 : index
    %6 = vector.load %arg4[%c0_4, %c0_5] : memref<1x512xf32, #tpu.memory_space<vmem>>, vector<1x512xf32>
    %7 = vector.broadcast %6 : vector<1x512xf32> to vector<256x512xf32>
    %8 = arith.addf %5, %7 : vector<256x512xf32>
    %cst_6 = arith.constant 5.000000e-01 : f32
    %9 = vector.broadcast %cst_6 : f32 to vector<256x512xf32>
    %10 = arith.mulf %9, %8 : vector<256x512xf32>
    %cst_7 = arith.constant 0.707106769 : f32
    %11 = vector.broadcast %cst_7 : f32 to vector<256x512xf32>
    %12 = arith.mulf %8, %11 : vector<256x512xf32>
    %13 = math.erf %12 : vector<256x512xf32>
    %cst_8 = arith.constant 1.000000e+00 : f32
    %14 = vector.broadcast %cst_8 : f32 to vector<256x512xf32>
    %15 = arith.addf %14, %13 : vector<256x512xf32>
    %16 = arith.mulf %10, %15 : vector<256x512xf32>
    %c0_9 = arith.constant 0 : index
    %c0_10 = arith.constant 0 : index
    %17 = vector.load %arg8[%c0_9, %c0_10] : memref<256x128xf32, #tpu.memory_space<vmem>>, vector<256x128xf32>
    %c0_11 = arith.constant 0 : index
    %c0_12 = arith.constant 0 : index
    %18 = vector.load %arg5[%c0_11, %c0_12] : memref<512x128xf32, #tpu.memory_space<vmem>>, vector<512x128xf32>
    %cst_13 = arith.constant dense<0.000000e+00> : vector<256x128xf32>
    %19 = tpu.matmul %16, %18, %cst_13 {dimension_numbers = #tpu.dot_dimension_numbers<[1], [0], [0], [1], [0, 0, 1, 1], [], []>} : vector<256x512xf32>, vector<512x128xf32>, vector<256x128xf32> -> vector<256x128xf32>
    %20 = arith.addf %17, %19 : vector<256x128xf32>
    %c0_14 = arith.constant 0 : index
    %c0_15 = arith.constant 0 : index
    %21 = vector.load %arg8[%c0_14, %c0_15] : memref<256x128xf32, #tpu.memory_space<vmem>>, vector<256x128xf32>
    tpu.vector_store %arg8[%c0_14, %c0_15], %20 {strides = array<i32>} : memref<256x128xf32, #tpu.memory_space<vmem>>, vector<256x128xf32>,
    %c0_i32_16 = arith.constant 0 : i32
    %22 = arith.cmpi eq, %arg1, %c0_i32_16 : i32
    %23 = arith.extui %22 : i1 to i32
    %c0_i32_17 = arith.constant 0 : i32
    %24 = arith.cmpi ne, %23, %c0_i32_17 : i32
    scf.if %24 {
      %c0_18 = arith.constant 0 : index
      %c0_19 = arith.constant 0 : index
      %25 = vector.load %arg8[%c0_18, %c0_19] : memref<256x128xf32, #tpu.memory_space<vmem>>, vector<256x128xf32>
      %c0_20 = arith.constant 0 : index
      %c0_21 = arith.constant 0 : index
      %26 = vector.load %arg6[%c0_20, %c0_21] : memref<1x128xf32, #tpu.memory_space<vmem>>, vector<1x128xf32>
      %27 = vector.broadcast %26 : vector<1x128xf32> to vector<256x128xf32>
      %28 = arith.addf %25, %27 : vector<256x128xf32>
      %c0_22 = arith.constant 0 : index
      %c0_23 = arith.constant 0 : index
      %29 = vector.load %arg7[%c0_22, %c0_23] : memref<256x128xf32, #tpu.memory_space<vmem>>, vector<256x128xf32>
      tpu.vector_store %arg7[%c0_22, %c0_23], %28 {strides = array<i32>} : memref<256x128xf32, #tpu.memory_space<vmem>>, vector<256x128xf32>,
    } else {
    }
    return
  }
  func.func @transform_0(%arg0: i32, %arg1: i32) -> (i32, i32) {
    %c0_i32 = arith.constant 0 : i32
    %c0_i32_0 = arith.constant 0 : i32
    return %arg0, %c0_i32 : i32, i32
  }
  func.func @transform_1(%arg0: i32, %arg1: i32) -> (i32, i32) {
    %c0_i32 = arith.constant 0 : i32
    %c0_i32_0 = arith.constant 0 : i32
    return %c0_i32, %arg1 : i32, i32
  }
  func.func @transform_2(%arg0: i32, %arg1: i32) -> (i32, i32) {
    %c0_i32 = arith.constant 0 : i32
    %c0_i32_0 = arith.constant 0 : i32
    return %c0_i32, %arg1 : i32, i32
  }
  func.func @transform_3(%arg0: i32, %arg1: i32) -> (i32, i32) {
    %c0_i32 = arith.constant 0 : i32
    %c0_i32_0 = arith.constant 0 : i32
    return %arg1, %c0_i32 : i32, i32
  }
  func.func @transform_4(%arg0: i32, %arg1: i32) -> (i32, i32) {
    %c0_i32 = arith.constant 0 : i32
    %c0_i32_0 = arith.constant 0 : i32
    %c0_i32_1 = arith.constant 0 : i32
    return %c0_i32, %c0_i32_0 : i32, i32
  }
  func.func @transform_5(%arg0: i32, %arg1: i32) -> (i32, i32) {
    %c0_i32 = arith.constant 0 : i32
    %c0_i32_0 = arith.constant 0 : i32
    return %arg0, %c0_i32 : i32, i32
  }
}

</mosaic_0001>

<bundles_post_ra>
// kernel: tpu_custom_call.1
= control target key start
LH: loop header
LB: loop body
LE: loop exit
PB: predicated region body
PF: predicated region fallthrough
CT: control target
= control target key end

     0   :  { %10 = vsyncpa [#allocation4], 0  ;;  %s3810_s0 = inlined_call_operand.hbm [shape: f32[256,128], index: 0, kind: input, shape index: {}]   ;;  %s3811_s1 = inlined_call_operand.hbm [shape: f32[128,512], index: 1, kind: input, shape index: {}]   ;;  %s3812_s2 = inlined_call_operand.vmem [shape: f32[1,512], index: 2, kind: input, shape index: {}]   ;;  %s3813_s3 = inlined_call_operand.hbm [shape: f32[512,128], index: 3, kind: input, shape index: {}]   ;;  %s3814_s4 = inlined_call_operand.vmem [shape: f32[1,128], index: 4, kind: input, shape index: {}]   ;;  %s3815_s5 = inlined_call_operand.hbm [shape: f32[256,128], index: 5, kind: output, shape index: {}]  }
   0x1   :  { %11 = vsyncpa [#allocation7], 0 }
   0x2   :  { %12 = vsyncpa [#allocation5], 0  ;;  %s2625_s18 = smov [#allocation6]   ;;  %s2531_s22 = scalar_lea.hbm %s3811_s1, 8192 }
   0x3   :  { %s30_s19 = sshll.u32 %s2625_s18, 4  ;;  %p2532_p0 = scmp.ne.s32.totalorder %s3811_s1, %s2531_s22  ;;  %s31_s19 = int_to_ptr.vmem [resolvable:$true] %s30_s19 }
   0x4   :  { %p2535_p1 = scmp.lt.u32.totalorder %s2531_s22, %s3811_s1 }
   0x6   :  { %p2537_p2 = pnand %p2535_p1, %p2532_p0 }
   0x8   :  { %2540 = shalt.err (!%p2537_p2)
}
   0x9   :  { %s2541_s27 = scalar_lea.vmem %s31_s19, 8192  ;;  %p2546_p4 = scmp.lt.s32.totalorder %s31_s19, %s31_s19 }
   0xa   :  { %p2542_p3 = scmp.ne.s32.totalorder %s31_s19, %s2541_s27  ;;  %p2547_p5 = scmp.lt.s32.totalorder %s2541_s27, %s2541_s27 }
   0xc   :  { %p2548_p6 = por %p2547_p5, %p2546_p4 }
   0xe   :  { %p2549_p7 = pnand %p2548_p6, %p2542_p3 }
  0x10   :  { %2552 = shalt.err (!%p2549_p7)
}
  0x11   :  { %s2626_s28 = smov 512   ;;  %s2627_s29 = smov 32  }
  0x12   :  { %36 = dma.hbm_to_vmem [thread:$0]  %s3811_s1, 8192, %s31_s19, [#allocation7], %s2626_s28, %s2626_s28, %s2627_s29  }
  0x13   :  { %s2628_s7 = smov [#allocation3]   ;;  %s2553_s11 = scalar_lea.hbm %s3810_s0, 4096 }
  0x14   :  { %s18_s8 = sshll.u32 %s2628_s7, 4  ;;  %p2554_p8 = scmp.ne.s32.totalorder %s3810_s0, %s2553_s11  ;;  %s19_s8 = int_to_ptr.vmem [resolvable:$true] %s18_s8 }
  0x15   :  { %p2557_p9 = scmp.lt.u32.totalorder %s2553_s11, %s3810_s0 }
  0x17   :  { %p2559_p10 = pnand %p2557_p9, %p2554_p8 }
  0x19   :  { %2562 = shalt.err (!%p2559_p10)
}
  0x1a   :  { %s2563_s16 = scalar_lea.vmem %s19_s8, 4096  ;;  %p2568_p12 = scmp.lt.s32.totalorder %s19_s8, %s19_s8 }
  0x1b   :  { %p2564_p11 = scmp.ne.s32.totalorder %s19_s8, %s2563_s16  ;;  %p2569_p13 = scmp.lt.s32.totalorder %s2563_s16, %s2563_s16 }
  0x1d   :  { %p2570_p0 = por %p2569_p13, %p2568_p12 }
  0x1f   :  { %p2571_p1 = pnand %p2570_p0, %p2564_p11 }
  0x21   :  { %2574 = shalt.err (!%p2571_p1)
}
  0x22   :  { %s2629_s1 = smov 128   ;;  %s2630_s17 = smov 8  }
  0x23   :  { %24 = dma.hbm_to_vmem [thread:$0]  %s3810_s0, 4096, %s19_s8, [#allocation4], %s2629_s1, %s2629_s1, %s2630_s17  }
  0x24   :  { %s2631_s20 = smov [#allocation8]   ;;  %s2575_s24 = scalar_lea.hbm %s3813_s3, 8192 }
  0x25   :  { %s44_s21 = sshll.u32 %s2631_s20, 4  ;;  %p2576_p2 = scmp.ne.s32.totalorder %s3813_s3, %s2575_s24  ;;  %s45_s21 = int_to_ptr.vmem [resolvable:$true] %s44_s21 }
  0x26   :  { %p2579_p3 = scmp.lt.u32.totalorder %s2575_s24, %s3813_s3 }
  0x28   :  { %p2581_p4 = pnand %p2579_p3, %p2576_p2 }
  0x2a   :  { %2584 = shalt.err (!%p2581_p4)
}
  0x2b   :  { %s2585_s29 = scalar_lea.vmem %s45_s21, 8192  ;;  %p2590_p6 = scmp.lt.s32.totalorder %s45_s21, %s45_s21 }
  0x2c   :  { %p2586_p5 = scmp.ne.s32.totalorder %s45_s21, %s2585_s29  ;;  %p2591_p7 = scmp.lt.s32.totalorder %s2585_s29, %s2585_s29 }
  0x2e   :  { %p2592_p8 = por %p2591_p7, %p2590_p6 }
  0x30   :  { %p2593_p9 = pnand %p2592_p8, %p2586_p5 }
  0x32   :  { %2596 = shalt.err (!%p2593_p9)
}
  0x33   :  { %50 = dma.hbm_to_vmem [thread:$0]  %s3813_s3, 8192, %s45_s21, [#allocation7], %s2629_s1, %s2629_s1, %s2630_s17  }
  0x34   :  { %2619 = dma.done.wait [#allocation4], 4096  }
  0x35   :  { %2620 = vsyncadd [#allocation4], 4294963200 }
  0x36   :  { %2621 = dma.done.wait [#allocation7], 16384  }
  0x37   :  { %2622 = vsyncadd [#allocation7], 4294950912  ;;  %v2632_v0 = vmov 0.0   ;;  %v131_v1 = vld [vmem:[#allocation6 + $0x8] sm:$0xff]  ;;  %v133_v3 = vld [vmem:[#allocation6 + $0x18] sm:$0xff] }
  0x38   :  { %280 = vmatprep.mubr.f32.mxu0 %v2632_v0  ;;  %537 = vmatprep.mubr.f32.mxu1 %v2632_v0  ;;  %v135_v2 = vld [vmem:[#allocation6 + $0x28] sm:$0xff]  ;;  %v137_v5 = vld [vmem:[#allocation6 + $0x38] sm:$0xff]  ;;  %v130_v6 = vld [vmem:[#allocation6] sm:$0xff] }
  0x39   :  { %v2105_v4 = vpack.c.bf16 %v135_v2, %v131_v1  ;;  %v134_v7 = vld [vmem:[#allocation6 + $0x20] sm:$0xff]  ;;  %v2137_v8 = vpack.c.bf16 %v137_v5, %v133_v3  ;;  %v132_v10 = vld [vmem:[#allocation6 + $0x10] sm:$0xff]  ;;  %v139_v12 = vld [vmem:[#allocation6 + $0x48] sm:$0xff] }
  0x3a   :  { %v2107_v9 = vpack.c.bf16 %v134_v7, %v130_v6  ;;  %v136_v11 = vld [vmem:[#allocation6 + $0x30] sm:$0xff]  ;;  %v143_v14 = vld [vmem:[#allocation6 + $0x68] sm:$0xff]  ;;  %v141_v15 = vld [vmem:[#allocation6 + $0x58] sm:$0xff] }
  0x3b   :  { %2106 = vmatprep.subr.bf16.mxu0 %v2105_v4  ;;  %v2139_v13 = vpack.c.bf16 %v136_v11, %v132_v10  ;;  %v145_v16 = vld [vmem:[#allocation6 + $0x78] sm:$0xff]  ;;  %2138 = vmatprep.subr.bf16.mxu1 %v2137_v8  ;;  %v2109_v17 = vpack.c.bf16 %v143_v14, %v139_v12  ;;  %v138_v19 = vld [vmem:[#allocation6 + $0x40] sm:$0xff]  ;;  %v140_v21 = vld [vmem:[#allocation6 + $0x50] sm:$0xff] }
  0x3c   :  { %2108 = vmatpush1.bf16.msra.mxu0 %v2107_v9  ;;  %v2141_v18 = vpack.c.bf16 %v145_v16, %v141_v15  ;;  %v142_v20 = vld [vmem:[#allocation6 + $0x60] sm:$0xff]  ;;  %v144_v23 = vld [vmem:[#allocation6 + $0x70] sm:$0xff]  ;;  %v147_v24 = vld [vmem:[#allocation6 + $0x88] sm:$0xff] }
  0x3d   :  { %2140 = vmatpush1.bf16.msra.mxu1 %v2139_v13  ;;  %v2111_v22 = vpack.c.bf16 %v142_v20, %v138_v19  ;;  %v151_v25 = vld [vmem:[#allocation6 + $0xa8] sm:$0xff]  ;;  %2110 = vmatprep.subr.bf16.mxu0 %v2109_v17  ;;  %v2143_v26 = vpack.c.bf16 %v144_v23, %v140_v21  ;;  %v149_v28 = vld [vmem:[#allocation6 + $0x98] sm:$0xff]  ;;  %v146_v30 = vld [vmem:[#allocation6 + $0x80] sm:$0xff] }
  0x3e   :  { %2142 = vmatprep.subr.bf16.mxu1 %v2141_v18  ;;  %v2113_v27 = vpack.c.bf16 %v151_v25, %v147_v24  ;;  %v153_v29 = vld [vmem:[#allocation6 + $0xb8] sm:$0xff]  ;;  %v150_v32 = vld [vmem:[#allocation6 + $0xa0] sm:$0xff]  ;;  %v148_v33 = vld [vmem:[#allocation6 + $0x90] sm:$0xff] }
  0x3f   :  { %v2145_v31 = vpack.c.bf16 %v153_v29, %v149_v28  ;;  %v152_v34 = vld [vmem:[#allocation6 + $0xb0] sm:$0xff]  ;;  %v2115_v35 = vpack.c.bf16 %v150_v32, %v146_v30  ;;  %v155_v36 = vld [vmem:[#allocation6 + $0xc8] sm:$0xff]  ;;  %v157_v38 = vld [vmem:[#allocation6 + $0xd8] sm:$0xff] }
  0x40   :  { %2112 = vmatpush1.bf16.msra.mxu0 %v2111_v22  ;;  %v159_v37 = vld [vmem:[#allocation6 + $0xe8] sm:$0xff]  ;;  %v2147_v39 = vpack.c.bf16 %v152_v34, %v148_v33  ;;  %v161_v41 = vld [vmem:[#allocation6 + $0xf8] sm:$0xff]  ;;  %v154_v42 = vld [vmem:[#allocation6 + $0xc0] sm:$0xff] }
  0x41   :  { %2144 = vmatpush1.bf16.msra.mxu1 %v2143_v26  ;;  %2114 = vmatprep.subr.bf16.mxu0 %v2113_v27  ;;  %v2117_v40 = vpack.c.bf16 %v159_v37, %v155_v36  ;;  %v158_v43 = vld [vmem:[#allocation6 + $0xe0] sm:$0xff]  ;;  %v2149_v44 = vpack.c.bf16 %v161_v41, %v157_v38  ;;  %v156_v45 = vld [vmem:[#allocation6 + $0xd0] sm:$0xff]  ;;  %v163_v47 = vld [vmem:[#allocation6 + $0x108] sm:$0xff] }
  0x42   :  { %2146 = vmatprep.subr.bf16.mxu1 %v2145_v31  ;;  %v160_v46 = vld [vmem:[#allocation6 + $0xf0] sm:$0xff]  ;;  %v167_v48 = vld [vmem:[#allocation6 + $0x128] sm:$0xff]  ;;  %v165_v49 = vld [vmem:[#allocation6 + $0x118] sm:$0xff]  ;;  %v2119_v51 = vpack.c.bf16 %v158_v43, %v154_v42 }
  0x43   :  { %v169_v50 = vld [vmem:[#allocation6 + $0x138] sm:$0xff]  ;;  %v2151_v52 = vpack.c.bf16 %v160_v46, %v156_v45  ;;  %v2121_v53 = vpack.c.bf16 %v167_v48, %v163_v47  ;;  %v162_v54 = vld [vmem:[#allocation6 + $0x100] sm:$0xff]  ;;  %v164_v56 = vld [vmem:[#allocation6 + $0x110] sm:$0xff] }
  0x44   :  { %2116 = vmatpush1.bf16.msra.mxu0 %v2115_v35  ;;  %v166_v55 = vld [vmem:[#allocation6 + $0x120] sm:$0xff]  ;;  %v2153_v57 = vpack.c.bf16 %v169_v50, %v165_v49  ;;  %v168_v58 = vld [vmem:[#allocation6 + $0x130] sm:$0xff]  ;;  %v171_v59 = vld [vmem:[#allocation6 + $0x148] sm:$0xff] }
  0x45   :  { %2148 = vmatpush1.bf16.msra.mxu1 %v2147_v39  ;;  %2118 = vmatprep.subr.bf16.mxu0 %v2117_v40  ;;  %v175_v60 = vld [vmem:[#allocation6 + $0x168] sm:$0xff]  ;;  %v173_v61 = vld [vmem:[#allocation6 + $0x158] sm:$0xff]  ;;  %v2123_v63 = vpack.c.bf16 %v166_v55, %v162_v54  ;;  %v2155_v1 = vpack.c.bf16 %v168_v58, %v164_v56  ;;  %v170_v3 = vld [vmem:[#allocation6 + $0x140] sm:$0xff]  ;;  %v2633_v39 = vmov 0.0|0.0  }
  0x46   :  { %2150 = vmatprep.subr.bf16.mxu1 %v2149_v44  ;;  %v177_v62 = vld [vmem:[#allocation6 + $0x178] sm:$0xff]  ;;  %v2125_v2 = vpack.c.bf16 %v175_v60, %v171_v59  ;;  %v174_v4 = vld [vmem:[#allocation6 + $0x160] sm:$0xff]  ;;  %v172_v5 = vld [vmem:[#allocation6 + $0x150] sm:$0xff] }
  0x47   :  { %v2157_v6 = vpack.c.bf16 %v177_v62, %v173_v61  ;;  %v176_v7 = vld [vmem:[#allocation6 + $0x170] sm:$0xff]  ;;  %v179_v8 = vld [vmem:[#allocation6 + $0x188] sm:$0xff]  ;;  %v181_v10 = vld [vmem:[#allocation6 + $0x198] sm:$0xff]  ;;  %v2127_v12 = vpack.c.bf16 %v174_v4, %v170_v3 }
  0x48   :  { %2120 = vmatpush1.bf16.msra.mxu0 %v2119_v51  ;;  %v183_v9 = vld [vmem:[#allocation6 + $0x1a8] sm:$0xff]  ;;  %v185_v11 = vld [vmem:[#allocation6 + $0x1b8] sm:$0xff]  ;;  %v2159_v13 = vpack.c.bf16 %v176_v7, %v172_v5  ;;  %v178_v15 = vld [vmem:[#allocation6 + $0x180] sm:$0xff] }
  0x49   :  { %2152 = vmatpush1.bf16.msra.mxu1 %v2151_v52  ;;  %2122 = vmatprep.subr.bf16.mxu0 %v2121_v53  ;;  %v2129_v14 = vpack.c.bf16 %v183_v9, %v179_v8  ;;  %v182_v16 = vld [vmem:[#allocation6 + $0x1a0] sm:$0xff]  ;;  %v180_v17 = vld [vmem:[#allocation6 + $0x190] sm:$0xff]  ;;  %v2161_v18 = vpack.c.bf16 %v185_v11, %v181_v10  ;;  %v187_v20 = vld [vmem:[#allocation6 + $0x1c8] sm:$0xff] }
  0x4a   :  { %2154 = vmatprep.subr.bf16.mxu1 %v2153_v57  ;;  %v184_v19 = vld [vmem:[#allocation6 + $0x1b0] sm:$0xff]  ;;  %v191_v21 = vld [vmem:[#allocation6 + $0x1e8] sm:$0xff]  ;;  %v189_v22 = vld [vmem:[#allocation6 + $0x1d8] sm:$0xff]  ;;  %v2131_v24 = vpack.c.bf16 %v182_v16, %v178_v15 }
  0x4b   :  { %v193_v23 = vld [vmem:[#allocation6 + $0x1f8] sm:$0xff]  ;;  %v2163_v25 = vpack.c.bf16 %v184_v19, %v180_v17  ;;  %v2133_v26 = vpack.c.bf16 %v191_v21, %v187_v20  ;;  %v186_v27 = vld [vmem:[#allocation6 + $0x1c0] sm:$0xff]  ;;  %v188_v30 = vld [vmem:[#allocation6 + $0x1d0] sm:$0xff] }
  0x4c   :  { %2124 = vmatpush1.bf16.msra.mxu0 %v2123_v63  ;;  %v190_v28 = vld [vmem:[#allocation6 + $0x1e0] sm:$0xff]  ;;  %v2165_v29 = vpack.c.bf16 %v193_v23, %v189_v22  ;;  %v192_v31 = vld [vmem:[#allocation6 + $0x1f0] sm:$0xff]  ;;  %v1403_v35 = vld [vmem:[#allocation8 + $0x8] sm:$0xff] }
  0x4d   :  { %2156 = vmatpush1.bf16.msra.mxu1 %v2155_v1  ;;  %2126 = vmatprep.subr.bf16.mxu0 %v2125_v2  ;;  %v2135_v32 = vpack.c.bf16 %v190_v28, %v186_v27  ;;  %v2167_v33 = vpack.c.bf16 %v192_v31, %v188_v30  ;;  %v1402_v34 = vld [vmem:[#allocation8] sm:$0xff]  ;;  %v1435_v37 = vld [vmem:[#allocation8 + $0x108] sm:$0xff]  ;;  %v1404_v42 = vld [vmem:[#allocation8 + $0x10] sm:$0xff] }
  0x4e   :  { %2158 = vmatprep.subr.bf16.mxu1 %v2157_v6  ;;  %v1434_v36 = vld [vmem:[#allocation8 + $0x100] sm:$0xff]  ;;  %v2170_v40 = vpack.c.bf16 %v1403_v35, %v1402_v34  ;;  %v1405_v43 = vld [vmem:[#allocation8 + $0x18] sm:$0xff]  ;;  %v1436_v44 = vld [vmem:[#allocation8 + $0x110] sm:$0xff] }
  0x4f   :  { %v98_v38 = vld [vmem:[#allocation3] sm:$0xff]  ;;  %v2218_v41 = vpack.c.bf16 %v1435_v37, %v1434_v36  ;;  %v1437_v45 = vld [vmem:[#allocation8 + $0x118] sm:$0xff]  ;;  %v99_v46 = vld [vmem:[#allocation3 + $0x8] sm:$0xff]  ;;  %v2173_v47 = vpack.c.bf16 %v1405_v43, %v1404_v42 }
  0x50   :  { %2128 = vmatpush1.bf16.msra.mxu0 %v2127_v12  ;;  %v2221_v48 = vpack.c.bf16 %v1437_v45, %v1436_v44  ;;  %v1406_v49 = vld [vmem:[#allocation8 + $0x20] sm:$0xff]  ;;  %v1407_v50 = vld [vmem:[#allocation8 + $0x28] sm:$0xff]  ;;  %v100_v53 = vld [vmem:[#allocation3 + $0x10] sm:$0xff] }
  0x51   :  { %2160 = vmatpush1.bf16.msra.mxu1 %v2159_v13  ;;  %2130 = vmatprep.subr.bf16.mxu0 %v2129_v14  ;;  %v1438_v51 = vld [vmem:[#allocation8 + $0x120] sm:$0xff]  ;;  %v1439_v52 = vld [vmem:[#allocation8 + $0x128] sm:$0xff]  ;;  %v2176_v54 = vpack.c.bf16 %v1407_v50, %v1406_v49  ;;  %v1408_v56 = vld [vmem:[#allocation8 + $0x30] sm:$0xff] }
  0x52   :  { %2162 = vmatprep.subr.bf16.mxu1 %v2161_v18  ;;  %v2224_v55 = vpack.c.bf16 %v1439_v52, %v1438_v51  ;;  %v1409_v57 = vld [vmem:[#allocation8 + $0x38] sm:$0xff]  ;;  %v1440_v58 = vld [vmem:[#allocation8 + $0x130] sm:$0xff]  ;;  %v1410_v63 = vld [vmem:[#allocation8 + $0x40] sm:$0xff] }
  0x53   :  { %v1441_v59 = vld [vmem:[#allocation8 + $0x138] sm:$0xff]  ;;  %v2179_v61 = vpack.c.bf16 %v1409_v57, %v1408_v56  ;;  %v1411_v1 = vld [vmem:[#allocation8 + $0x48] sm:$0xff]  ;;  %v1442_v2 = vld [vmem:[#allocation8 + $0x140] sm:$0xff] }
  0x54   :  { %2132 = vmatpush1.bf16.msra.mxu0 %v2131_v24  ;;  %v101_v60 = vld [vmem:[#allocation3 + $0x18] sm:$0xff]  ;;  %v2227_v62 = vpack.c.bf16 %v1441_v59, %v1440_v58  ;;  %v1443_v3 = vld [vmem:[#allocation8 + $0x148] sm:$0xff]  ;;  %v102_v4 = vld [vmem:[#allocation3 + $0x20] sm:$0xff]  ;;  %v2182_v5 = vpack.c.bf16 %v1411_v1, %v1410_v63 }
  0x55   :  { %2164 = vmatpush1.bf16.msra.mxu1 %v2163_v25  ;;  %2134 = vmatprep.subr.bf16.mxu0 %v2133_v26  ;;  %v2230_v6 = vpack.c.bf16 %v1443_v3, %v1442_v2  ;;  %v1412_v7 = vld [vmem:[#allocation8 + $0x50] sm:$0xff]  ;;  %v1413_v8 = vld [vmem:[#allocation8 + $0x58] sm:$0xff]  ;;  %v103_v11 = vld [vmem:[#allocation3 + $0x28] sm:$0xff] }
  0x56   :  { %2166 = vmatprep.subr.bf16.mxu1 %v2165_v29  ;;  %v1444_v9 = vld [vmem:[#allocation8 + $0x150] sm:$0xff]  ;;  %v1445_v10 = vld [vmem:[#allocation8 + $0x158] sm:$0xff]  ;;  %v2185_v12 = vpack.c.bf16 %v1413_v8, %v1412_v7  ;;  %v1414_v14 = vld [vmem:[#allocation8 + $0x60] sm:$0xff] }
  0x57   :  { %v2233_v13 = vpack.c.bf16 %v1445_v10, %v1444_v9  ;;  %v1415_v15 = vld [vmem:[#allocation8 + $0x68] sm:$0xff]  ;;  %v1446_v16 = vld [vmem:[#allocation8 + $0x160] sm:$0xff]  ;;  %v104_v18 = vld [vmem:[#allocation3 + $0x30] sm:$0xff] }
  0x58   :  { %2136 = vmatpush1.bf16.msra.mxu0 %v2135_v32  ;;  %v1447_v17 = vld [vmem:[#allocation8 + $0x168] sm:$0xff]  ;;  %v2188_v19 = vpack.c.bf16 %v1415_v15, %v1414_v14  ;;  %v1416_v21 = vld [vmem:[#allocation8 + $0x70] sm:$0xff]  ;;  %v1417_v22 = vld [vmem:[#allocation8 + $0x78] sm:$0xff] }
  0x59   :  { %2168 = vmatpush1.bf16.msra.mxu1 %v2167_v33  ;;  %2169 = vmatprep.subr.bf16.mxu0 %v2633_v39  ;;  %v2236_v20 = vpack.c.bf16 %v1447_v17, %v1446_v16  ;;  %v1448_v23 = vld [vmem:[#allocation8 + $0x170] sm:$0xff]  ;;  %v1449_v24 = vld [vmem:[#allocation8 + $0x178] sm:$0xff]  ;;  %v2191_v26 = vpack.c.bf16 %v1417_v22, %v1416_v21  ;;  %v1418_v28 = vld [vmem:[#allocation8 + $0x80] sm:$0xff] }
  0x5a   :  { %2217 = vmatprep.subr.bf16.mxu1 %v2633_v39  ;;  %v105_v25 = vld [vmem:[#allocation3 + $0x38] sm:$0xff]  ;;  %v2239_v27 = vpack.c.bf16 %v1449_v24, %v1448_v23  ;;  %v1419_v29 = vld [vmem:[#allocation8 + $0x88] sm:$0xff]  ;;  %v1450_v30 = vld [vmem:[#allocation8 + $0x180] sm:$0xff] }
  0x5b   :  { %281 = vmatmul.mubr.f32.vlgmr.msra.gmra.mrb[0].mxu0 %v98_v38  ;;  %v1451_v31 = vld [vmem:[#allocation8 + $0x188] sm:$0xff]  ;;  %v106_v32 = vld [vmem:[#allocation3 + $0x40] sm:$0xff]  ;;  %v2194_v33 = vpack.c.bf16 %v1419_v29, %v1418_v28  ;;  %v1420_v35 = vld [vmem:[#allocation8 + $0x90] sm:$0xff] }
  0x5c   :  { %538 = vmatmul.mubr.f32.vlgmr.msra.gmra.mrb[0].mxu1 %v98_v38  ;;  %286 = vmatprep.mubr.f32.mxu0 %v2632_v0  ;;  %v2242_v34 = vpack.c.bf16 %v1451_v31, %v1450_v30  ;;  %v1421_v36 = vld [vmem:[#allocation8 + $0x98] sm:$0xff]  ;;  %v1452_v37 = vld [vmem:[#allocation8 + $0x190] sm:$0xff]  ;;  %v1422_v43 = vld [vmem:[#allocation8 + $0xa0] sm:$0xff] }
  0x5d   :  { %543 = vmatprep.mubr.f32.mxu1 %v2632_v0  ;;  %2171 = vmatpush1.bf16.msra.mxu0 %v2170_v40  ;;  %v1453_v38 = vld [vmem:[#allocation8 + $0x198] sm:$0xff]  ;;  %v107_v40 = vld [vmem:[#allocation3 + $0x48] sm:$0xff]  ;;  %v1454_v45 = vld [vmem:[#allocation8 + $0x1a0] sm:$0xff] }
  0x5e   :  { %2219 = vmatpush1.bf16.msra.mxu1 %v2218_v41  ;;  %2172 = vmatprep.subr.bf16.mxu0 %v2633_v39  ;;  %v2197_v41 = vpack.c.bf16 %v1421_v36, %v1420_v35  ;;  %v2245_v42 = vpack.c.bf16 %v1453_v38, %v1452_v37  ;;  %v1423_v44 = vld [vmem:[#allocation8 + $0xa8] sm:$0xff]  ;;  %v1424_v50 = vld [vmem:[#allocation8 + $0xb0] sm:$0xff]  ;;  %v1425_v51 = vld [vmem:[#allocation8 + $0xb8] sm:$0xff]  ;;  %v196_v37 = vlaneseq }
  0x5f   :  { %287 = vmatmul.mubr.f32.gmra.mrb[2].mxu0 %v99_v46  ;;  %2220 = vmatprep.subr.bf16.mxu1 %v2633_v39  ;;  %v1456_v52 = vld [vmem:[#allocation8 + $0x1b0] sm:$0xff]  ;;  %v1426_v57 = vld [vmem:[#allocation8 + $0xc0] sm:$0xff]  ;;  %v1427_v58 = vld [vmem:[#allocation8 + $0xc8] sm:$0xff] }
  0x60   :  { %544 = vmatmul.mubr.f32.gmra.mrb[2].mxu1 %v99_v46  ;;  %292 = vmatprep.mubr.f32.mxu0 %v2632_v0  ;;  %v1455_v46 = vld [vmem:[#allocation8 + $0x1a8] sm:$0xff]  ;;  %v1458_v59 = vld [vmem:[#allocation8 + $0x1c0] sm:$0xff]  ;;  %v1428_v1 = vld [vmem:[#allocation8 + $0xd0] sm:$0xff]  ;;  %v197_v38 = vshrl.u32 %v196_v37, 7 }
  0x61   :  { %549 = vmatprep.mubr.f32.mxu1 %v2632_v0  ;;  %2174 = vmatpush1.bf16.msra.mxu0 %v2173_v47  ;;  %v108_v47 = vld [vmem:[#allocation3 + $0x50] sm:$0xff]  ;;  %v2248_v49 = vpack.c.bf16 %v1455_v46, %v1454_v45  ;;  %v1429_v2 = vld [vmem:[#allocation8 + $0xd8] sm:$0xff]  ;;  %v114_v10 = vld [vmem:[#allocation3 + $0x80] sm:$0xff] }
  0x62   :  { %2222 = vmatpush1.bf16.msra.mxu1 %v2221_v48  ;;  %2175 = vmatprep.subr.bf16.mxu0 %v2633_v39  ;;  %v2200_v48 = vpack.c.bf16 %v1423_v44, %v1422_v43  ;;  %v1460_v3 = vld [vmem:[#allocation8 + $0x1d0] sm:$0xff]  ;;  %v113_v9 = vld [vmem:[#allocation3 + $0x78] sm:$0xff]  ;;  %v118_v14 = vld [vmem:[#allocation3 + $0xa0] sm:$0xff]  ;;  %v202_v43 = vsub.s32 1, %v197_v38  ;;  %v210_v45 = vsub.s32 3, %v197_v38 }
  0x63   :  { %293 = vmatmul.mubr.f32.gmra.mrb[4].mxu0 %v100_v53  ;;  %2223 = vmatprep.subr.bf16.mxu1 %v2633_v39  ;;  %v112_v8 = vld [vmem:[#allocation3 + $0x70] sm:$0xff]  ;;  %v119_v15 = vld [vmem:[#allocation3 + $0xa8] sm:$0xff]  ;;  %v121_v17 = vld [vmem:[#allocation3 + $0xb8] sm:$0xff] }
  0x64   :  { %550 = vmatmul.mubr.f32.gmra.mrb[4].mxu1 %v100_v53  ;;  %298 = vmatprep.mubr.f32.mxu0 %v2632_v0  ;;  %v1457_v53 = vld [vmem:[#allocation8 + $0x1b8] sm:$0xff]  ;;  %v120_v16 = vld [vmem:[#allocation3 + $0xb0] sm:$0xff]  ;;  %v1431_v21 = vld [vmem:[#allocation8 + $0xe8] sm:$0xff] }
  0x65   :  { %555 = vmatprep.mubr.f32.mxu1 %v2632_v0  ;;  %2177 = vmatpush1.bf16.msra.mxu0 %v2176_v54  ;;  %v109_v54 = vld [vmem:[#allocation3 + $0x58] sm:$0xff]  ;;  %v2251_v56 = vpack.c.bf16 %v1457_v53, %v1456_v52  ;;  %v1462_v22 = vld [vmem:[#allocation8 + $0x1e0] sm:$0xff]  ;;  %v1463_v24 = vld [vmem:[#allocation8 + $0x1e8] sm:$0xff] }
  0x66   :  { %2225 = vmatpush1.bf16.msra.mxu1 %v2224_v55  ;;  %2178 = vmatprep.subr.bf16.mxu0 %v2633_v39  ;;  %v2203_v55 = vpack.c.bf16 %v1425_v51, %v1424_v50  ;;  %v1433_v28 = vld [vmem:[#allocation8 + $0xf8] sm:$0xff]  ;;  %v1464_v29 = vld [vmem:[#allocation8 + $0x1f0] sm:$0xff] }
  0x67   :  { %299 = vmatmul.mubr.f32.gmra.mrb[6].mxu0 %v101_v60  ;;  %2226 = vmatprep.subr.bf16.mxu1 %v2633_v39  ;;  %v125_v30 = vld [vmem:[#allocation3 + $0xd8] sm:$0xff]  ;;  %v128_v35 = vld [vmem:[#allocation3 + $0xf0] sm:$0xff] }
  0x68   :  { %556 = vmatmul.mubr.f32.gmra.mrb[6].mxu1 %v101_v60  ;;  %304 = vmatprep.mubr.f32.mxu0 %v2632_v0  ;;  %v1459_v60 = vld [vmem:[#allocation8 + $0x1c8] sm:$0xff]  ;;  %v129_v36 = vld [vmem:[#allocation3 + $0xf8] sm:$0xff] }
  0x69   :  { %561 = vmatprep.mubr.f32.mxu1 %v2632_v0  ;;  %2180 = vmatpush1.bf16.msra.mxu0 %v2179_v61  ;;  %v110_v61 = vld [vmem:[#allocation3 + $0x60] sm:$0xff]  ;;  %v2254_v63 = vpack.c.bf16 %v1459_v60, %v1458_v59 }
  0x6a   :  { %2228 = vmatpush1.bf16.msra.mxu1 %v2227_v62  ;;  %2181 = vmatprep.subr.bf16.mxu0 %v2633_v39  ;;  %v2206_v62 = vpack.c.bf16 %v1427_v58, %v1426_v57 }
  0x6b   :  { %305 = vmatmul.mubr.f32.gmra.mrb[8].mxu0 %v102_v4  ;;  %2229 = vmatprep.subr.bf16.mxu1 %v2633_v39 }
  0x6c   :  { %562 = vmatmul.mubr.f32.gmra.mrb[8].mxu1 %v102_v4  ;;  %310 = vmatprep.mubr.f32.mxu0 %v2632_v0  ;;  %v1461_v4 = vld [vmem:[#allocation8 + $0x1d8] sm:$0xff] }
  0x6d   :  { %567 = vmatprep.mubr.f32.mxu1 %v2632_v0  ;;  %2183 = vmatpush1.bf16.msra.mxu0 %v2182_v5  ;;  %v111_v5 = vld [vmem:[#allocation3 + $0x68] sm:$0xff]  ;;  %v2257_v7 = vpack.c.bf16 %v1461_v4, %v1460_v3 }
  0x6e   :  { %2231 = vmatpush1.bf16.msra.mxu1 %v2230_v6  ;;  %2184 = vmatprep.subr.bf16.mxu0 %v2633_v39  ;;  %v2209_v6 = vpack.c.bf16 %v1429_v2, %v1428_v1 }
  0x6f   :  { %311 = vmatmul.mubr.f32.gmra.mrb[10].mxu0 %v103_v11  ;;  %2232 = vmatprep.subr.bf16.mxu1 %v2633_v39 }
  0x70   :  { %568 = vmatmul.mubr.f32.gmra.mrb[10].mxu1 %v103_v11  ;;  %316 = vmatprep.mubr.f32.mxu0 %v2632_v0  ;;  %v115_v11 = vld [vmem:[#allocation3 + $0x88] sm:$0xff] }
  0x71   :  { %573 = vmatprep.mubr.f32.mxu1 %v2632_v0  ;;  %2186 = vmatpush1.bf16.msra.mxu0 %v2185_v12  ;;  %v116_v12 = vld [vmem:[#allocation3 + $0x90] sm:$0xff] }
  0x72   :  { %2234 = vmatpush1.bf16.msra.mxu1 %v2233_v13  ;;  %2187 = vmatprep.subr.bf16.mxu0 %v2633_v39  ;;  %v117_v13 = vld [vmem:[#allocation3 + $0x98] sm:$0xff] }
  0x73   :  { %317 = vmatmul.mubr.f32.gmra.mrb[12].mxu0 %v104_v18  ;;  %2235 = vmatprep.subr.bf16.mxu1 %v2633_v39 }
  0x74   :  { %574 = vmatmul.mubr.f32.gmra.mrb[12].mxu1 %v104_v18  ;;  %322 = vmatprep.mubr.f32.mxu0 %v2632_v0  ;;  %v122_v18 = vld [vmem:[#allocation3 + $0xc0] sm:$0xff] }
  0x75   :  { %579 = vmatprep.mubr.f32.mxu1 %v2632_v0  ;;  %2189 = vmatpush1.bf16.msra.mxu0 %v2188_v19  ;;  %v123_v19 = vld [vmem:[#allocation3 + $0xc8] sm:$0xff] }
  0x76   :  { %2237 = vmatpush1.bf16.msra.mxu1 %v2236_v20  ;;  %2190 = vmatprep.subr.bf16.mxu0 %v2633_v39  ;;  %v1430_v20 = vld [vmem:[#allocation8 + $0xe0] sm:$0xff] }
  0x77   :  { %323 = vmatmul.mubr.f32.gmra.mrb[14].mxu0 %v105_v25  ;;  %2238 = vmatprep.subr.bf16.mxu1 %v2633_v39  ;;  %v2212_v23 = vpack.c.bf16 %v1431_v21, %v1430_v20 }
  0x78   :  { %580 = vmatmul.mubr.f32.gmra.mrb[14].mxu1 %v105_v25  ;;  %328 = vmatprep.mubr.f32.mxu0 %v2632_v0  ;;  %v2260_v25 = vpack.c.bf16 %v1463_v24, %v1462_v22 }
  0x79   :  { %585 = vmatprep.mubr.f32.mxu1 %v2632_v0  ;;  %2192 = vmatpush1.bf16.msra.mxu0 %v2191_v26  ;;  %v124_v26 = vld [vmem:[#allocation3 + $0xd0] sm:$0xff] }
  0x7a   :  { %2240 = vmatpush1.bf16.msra.mxu1 %v2239_v27  ;;  %2193 = vmatprep.subr.bf16.mxu0 %v2633_v39  ;;  %v1432_v27 = vld [vmem:[#allocation8 + $0xf0] sm:$0xff] }
  0x7b   :  { %329 = vmatmul.mubr.f32.gmra.mrb[16].mxu0 %v106_v32  ;;  %2241 = vmatprep.subr.bf16.mxu1 %v2633_v39  ;;  %v2215_v31 = vpack.c.bf16 %v1433_v28, %v1432_v27 }
  0x7c   :  { %586 = vmatmul.mubr.f32.gmra.mrb[16].mxu1 %v106_v32  ;;  %334 = vmatprep.mubr.f32.mxu0 %v2632_v0  ;;  %v1465_v32 = vld [vmem:[#allocation8 + $0x1f8] sm:$0xff] }
  0x7d   :  { %591 = vmatprep.mubr.f32.mxu1 %v2632_v0  ;;  %2195 = vmatpush1.bf16.msra.mxu0 %v2194_v33  ;;  %v2263_v33 = vpack.c.bf16 %v1465_v32, %v1464_v29 }
  0x7e   :  { %2243 = vmatpush1.bf16.msra.mxu1 %v2242_v34  ;;  %2196 = vmatprep.subr.bf16.mxu0 %v2633_v39  ;;  %v126_v34 = vld [vmem:[#allocation3 + $0xe0] sm:$0xff] }
  0x7f   :  { %335 = vmatmul.mubr.f32.gmra.mrb[18].mxu0 %v107_v40  ;;  %2244 = vmatprep.subr.bf16.mxu1 %v2633_v39 }
  0x80   :  { %592 = vmatmul.mubr.f32.gmra.mrb[18].mxu1 %v107_v40  ;;  %340 = vmatprep.mubr.f32.mxu0 %v2632_v0  ;;  %v198_v40 = vsub.s32 0, %v197_v38 }
  0x81   :  { %597 = vmatprep.mubr.f32.mxu1 %v2632_v0  ;;  %2198 = vmatpush1.bf16.msra.mxu0 %v2197_v41  ;;  %v194_v41 = vld [vmem:[%s3812_s2] sm:$0xf] }
  0x82   :  { %2246 = vmatpush1.bf16.msra.mxu1 %v2245_v42  ;;  %2199 = vmatprep.subr.bf16.mxu0 %v2633_v39  ;;  %v206_v42 = vsub.s32 2, %v197_v38  ;;  %v2806_v44 = vrot.slane %v194_v41, %v198_v40  ;;  %v2813_v51 = vrot.slane %v194_v41, %v210_v45 }
  0x83   :  { %341 = vmatmul.mubr.f32.gmra.mrb[20].mxu0 %v108_v47  ;;  %2247 = vmatprep.subr.bf16.mxu1 %v2633_v39 }
  0x84   :  { %598 = vmatmul.mubr.f32.gmra.mrb[20].mxu1 %v108_v47  ;;  %346 = vmatprep.mubr.f32.mxu0 %v2632_v0  ;;  %v2808_v46 = vrot.slane %v194_v41, %v206_v42 }
  0x85   :  { %603 = vmatprep.mubr.f32.mxu1 %v2632_v0  ;;  %2201 = vmatpush1.bf16.msra.mxu0 %v2200_v48  ;;  %v2810_v48 = vrot.slane %v194_v41, %v202_v43 }
  0x86   :  { %2249 = vmatpush1.bf16.msra.mxu1 %v2248_v49  ;;  %2202 = vmatprep.subr.bf16.mxu0 %v2633_v39 }
  0x87   :  { %347 = vmatmul.mubr.f32.gmra.mrb[22].mxu0 %v109_v54  ;;  %2250 = vmatprep.subr.bf16.mxu1 %v2633_v39 }
  0x88   :  { %604 = vmatmul.mubr.f32.gmra.mrb[22].mxu1 %v109_v54  ;;  %352 = vmatprep.mubr.f32.mxu0 %v2632_v0 }
  0x89   :  { %609 = vmatprep.mubr.f32.mxu1 %v2632_v0  ;;  %2204 = vmatpush1.bf16.msra.mxu0 %v2203_v55 }
  0x8a   :  { %2252 = vmatpush1.bf16.msra.mxu1 %v2251_v56  ;;  %2205 = vmatprep.subr.bf16.mxu0 %v2633_v39 }
  0x8b   :  { %353 = vmatmul.mubr.f32.gmra.mrb[24].mxu0 %v110_v61  ;;  %2253 = vmatprep.subr.bf16.mxu1 %v2633_v39 }
  0x8c   :  { %610 = vmatmul.mubr.f32.gmra.mrb[24].mxu1 %v110_v61  ;;  %358 = vmatprep.mubr.f32.mxu0 %v2632_v0 }
  0x8d   :  { %615 = vmatprep.mubr.f32.mxu1 %v2632_v0  ;;  %2207 = vmatpush1.bf16.msra.mxu0 %v2206_v62 }
  0x8e   :  { %2255 = vmatpush1.bf16.msra.mxu1 %v2254_v63  ;;  %2208 = vmatprep.subr.bf16.mxu0 %v2633_v39 }
  0x8f   :  { %359 = vmatmul.mubr.f32.gmra.mrb[26].mxu0 %v111_v5  ;;  %2256 = vmatprep.subr.bf16.mxu1 %v2633_v39 }
  0x90   :  { %616 = vmatmul.mubr.f32.gmra.mrb[26].mxu1 %v111_v5  ;;  %364 = vmatprep.mubr.f32.mxu0 %v2632_v0 }
  0x91   :  { %621 = vmatprep.mubr.f32.mxu1 %v2632_v0  ;;  %2210 = vmatpush1.bf16.msra.mxu0 %v2209_v6 }
  0x92   :  { %2258 = vmatpush1.bf16.msra.mxu1 %v2257_v7  ;;  %2211 = vmatprep.subr.bf16.mxu0 %v2633_v39 }
  0x93   :  { %365 = vmatmul.mubr.f32.gmra.mrb[28].mxu0 %v112_v8  ;;  %2259 = vmatprep.subr.bf16.mxu1 %v2633_v39 }
  0x94   :  { %622 = vmatmul.mubr.f32.gmra.mrb[28].mxu1 %v112_v8  ;;  %370 = vmatprep.mubr.f32.mxu0 %v2632_v0 }
  0x95   :  { %627 = vmatprep.mubr.f32.mxu1 %v2632_v0  ;;  %2213 = vmatpush1.bf16.msra.mxu0 %v2212_v23 }
  0x96   :  { %2261 = vmatpush1.bf16.msra.mxu1 %v2260_v25  ;;  %2214 = vmatprep.subr.bf16.mxu0 %v2633_v39 }
  0x97   :  { %371 = vmatmul.mubr.f32.gmra.mrb[30].mxu0 %v113_v9  ;;  %2262 = vmatprep.subr.bf16.mxu1 %v2633_v39  ;;  %v127_v39 = vld [vmem:[#allocation3 + $0xe8] sm:$0xff] }
  0x98   :  { %628 = vmatmul.mubr.f32.gmra.mrb[30].mxu1 %v113_v9  ;;  %376 = vmatprep.mubr.f32.mxu0 %v2632_v0 }
  0x99   :  { %633 = vmatprep.mubr.f32.mxu1 %v2632_v0  ;;  %2216 = vmatpush1.bf16.msra.mxu0 %v2215_v31 }
  0x9a   :  { %2264 = vmatpush1.bf16.msra.mxu1 %v2263_v33 }
  0x9b   :  { %377 = vmatmul.mubr.f32.gmra.mrb[32].mxu0 %v114_v10 }
  0x9c   :  { %634 = vmatmul.mubr.f32.gmra.mrb[32].mxu1 %v114_v10  ;;  %382 = vmatprep.mubr.f32.mxu0 %v2632_v0 }
  0x9d   :  { %639 = vmatprep.mubr.f32.mxu1 %v2632_v0 }
  0x9f   :  { %383 = vmatmul.mubr.f32.gmra.mrb[34].mxu0 %v115_v11 }
  0xa0   :  { %640 = vmatmul.mubr.f32.gmra.mrb[34].mxu1 %v115_v11  ;;  %388 = vmatprep.mubr.f32.mxu0 %v2632_v0 }
  0xa1   :  { %645 = vmatprep.mubr.f32.mxu1 %v2632_v0 }
  0xa3   :  { %389 = vmatmul.mubr.f32.gmra.mrb[36].mxu0 %v116_v12 }
  0xa4   :  { %646 = vmatmul.mubr.f32.gmra.mrb[36].mxu1 %v116_v12  ;;  %394 = vmatprep.mubr.f32.mxu0 %v2632_v0 }
  0xa5   :  { %651 = vmatprep.mubr.f32.mxu1 %v2632_v0 }
  0xa7   :  { %395 = vmatmul.mubr.f32.gmra.mrb[38].mxu0 %v117_v13 }
  0xa8   :  { %652 = vmatmul.mubr.f32.gmra.mrb[38].mxu1 %v117_v13  ;;  %400 = vmatprep.mubr.f32.mxu0 %v2632_v0 }
  0xa9   :  { %657 = vmatprep.mubr.f32.mxu1 %v2632_v0 }
  0xab   :  { %401 = vmatmul.mubr.f32.gmra.mrb[40].mxu0 %v118_v14 }
  0xac   :  { %658 = vmatmul.mubr.f32.gmra.mrb[40].mxu1 %v118_v14  ;;  %406 = vmatprep.mubr.f32.mxu0 %v2632_v0 }
  0xad   :  { %663 = vmatprep.mubr.f32.mxu1 %v2632_v0 }
  0xaf   :  { %407 = vmatmul.mubr.f32.gmra.mrb[42].mxu0 %v119_v15 }
  0xb0   :  { %664 = vmatmul.mubr.f32.gmra.mrb[42].mxu1 %v119_v15  ;;  %412 = vmatprep.mubr.f32.mxu0 %v2632_v0 }
  0xb1   :  { %669 = vmatprep.mubr.f32.mxu1 %v2632_v0 }
  0xb3   :  { %413 = vmatmul.mubr.f32.gmra.mrb[44].mxu0 %v120_v16 }
  0xb4   :  { %670 = vmatmul.mubr.f32.gmra.mrb[44].mxu1 %v120_v16  ;;  %418 = vmatprep.mubr.f32.mxu0 %v2632_v0 }
  0xb5   :  { %675 = vmatprep.mubr.f32.mxu1 %v2632_v0 }
  0xb7   :  { %419 = vmatmul.mubr.f32.gmra.mrb[46].mxu0 %v121_v17 }
  0xb8   :  { %676 = vmatmul.mubr.f32.gmra.mrb[46].mxu1 %v121_v17  ;;  %424 = vmatprep.mubr.f32.mxu0 %v2632_v0 }
  0xb9   :  { %681 = vmatprep.mubr.f32.mxu1 %v2632_v0 }
  0xbb   :  { %425 = vmatmul.mubr.f32.gmra.mrb[48].mxu0 %v122_v18 }
  0xbc   :  { %682 = vmatmul.mubr.f32.gmra.mrb[48].mxu1 %v122_v18  ;;  %430 = vmatprep.mubr.f32.mxu0 %v2632_v0 }
  0xbd   :  { %687 = vmatprep.mubr.f32.mxu1 %v2632_v0 }
  0xbf   :  { %431 = vmatmul.mubr.f32.gmra.mrb[50].mxu0 %v123_v19 }
  0xc0   :  { %688 = vmatmul.mubr.f32.gmra.mrb[50].mxu1 %v123_v19  ;;  %436 = vmatprep.mubr.f32.mxu0 %v2632_v0 }
  0xc1   :  { %693 = vmatprep.mubr.f32.mxu1 %v2632_v0 }
  0xc3   :  { %437 = vmatmul.mubr.f32.gmra.mrb[52].mxu0 %v124_v26 }
  0xc4   :  { %694 = vmatmul.mubr.f32.gmra.mrb[52].mxu1 %v124_v26  ;;  %442 = vmatprep.mubr.f32.mxu0 %v2632_v0 }
  0xc5   :  { %699 = vmatprep.mubr.f32.mxu1 %v2632_v0 }
  0xc7   :  { %443 = vmatmul.mubr.f32.gmra.mrb[54].mxu0 %v125_v30 }
  0xc8   :  { %700 = vmatmul.mubr.f32.gmra.mrb[54].mxu1 %v125_v30  ;;  %448 = vmatprep.mubr.f32.mxu0 %v2632_v0 }
  0xc9   :  { %705 = vmatprep.mubr.f32.mxu1 %v2632_v0 }
  0xcb   :  { %449 = vmatmul.mubr.f32.gmra.mrb[56].mxu0 %v126_v34 }
  0xcc   :  { %706 = vmatmul.mubr.f32.gmra.mrb[56].mxu1 %v126_v34  ;;  %454 = vmatprep.mubr.f32.mxu0 %v2632_v0 }
  0xcd   :  { %711 = vmatprep.mubr.f32.mxu1 %v2632_v0 }
  0xcf   :  { %455 = vmatmul.mubr.f32.gmra.mrb[58].mxu0 %v127_v39 }
  0xd0   :  { %712 = vmatmul.mubr.f32.gmra.mrb[58].mxu1 %v127_v39  ;;  %460 = vmatprep.mubr.f32.mxu0 %v2632_v0 }
  0xd1   :  { %717 = vmatprep.mubr.f32.mxu1 %v2632_v0 }
  0xd3   :  { %461 = vmatmul.mubr.f32.gmra.mrb[60].mxu0 %v128_v35 }
  0xd4   :  { %718 = vmatmul.mubr.f32.gmra.mrb[60].mxu1 %v128_v35  ;;  %466 = vmatprep.mubr.f32.mxu0 %v2632_v0 }
  0xd5   :  { %723 = vmatprep.mubr.f32.mxu1 %v2632_v0 }
  0xd7   :  { %467 = vmatmul.mubr.f32.gmra.mrb[62].mxu0 %v129_v36 }
  0xd8   :  { %724 = vmatmul.mubr.f32.gmra.mrb[62].mxu1 %v129_v36 }
 0x12e   :  { %v282_v47 = vpop.f32.mrb[0].mxu0 }
 0x12f   :  { %v283_v0 = vadd.f32 %v282_v47, %v2806_v44  ;;  %v539_v49 = vpop.f32.mrb[0].mxu1  ;;  %v284_v50 = vpop.f32.mrb[1].mxu0 }
 0x130   :  { %v540_v52 = vadd.f32 %v539_v49, %v2808_v46  ;;  %v541_v53 = vpop.f32.mrb[1].mxu1  ;;  %v285_v55 = vadd.f32 %v284_v50, %v2810_v48 }
 0x131   :  { %v858_v54 = vmul.f32 0.70710677, %v283_v0  ;;  %v542_v57 = vadd.f32 %v541_v53, %v2813_v51  ;;  %v730_v23 = vmul.f32 0.5, %v283_v0 }
 0x132   :  { %v860_v56 = vmul.f32 0.70710677, %v540_v52  ;;  %v288_v58 = vpop.f32.mrb[2].mxu0  ;;  %v859_v1 = vmul.f32 0.70710677, %v285_v55  ;;  %v732_v29 = vmul.f32 0.5, %v540_v52 }
 0x133   :  { %v545_v59 = vpop.f32.mrb[2].mxu1  ;;  %v289_v60 = vadd.f32 %v288_v58, %v2806_v44  ;;  %v290_v61 = vpop.f32.mrb[3].mxu0  ;;  %2275 = verf.f32 %v858_v54  ;;  %v861_v4 = vmul.f32 0.70710677, %v542_v57  ;;  %v2827_v30 = vmul.f32 0.5, %v285_v55 }
 0x134   :  { %v547_v62 = vpop.f32.mrb[3].mxu1  ;;  %v546_v63 = vadd.f32 %v545_v59, %v2808_v46  ;;  %v291_v2 = vadd.f32 %v290_v61, %v2810_v48  ;;  %2277 = verf.f32 %v860_v56  ;;  %v2830_v39 = vmul.f32 0.5, %v542_v57 }
 0x135   :  { %v548_v5 = vadd.f32 %v547_v62, %v2813_v51  ;;  %v862_v6 = vmul.f32 0.70710677, %v289_v60  ;;  %2279 = verf.f32 %v859_v1  ;;  %v2832_v35 = vmul.f32 0.5, %v289_v60 }
 0x136   :  { %v294_v3 = vpop.f32.mrb[4].mxu0  ;;  %v864_v9 = vmul.f32 0.70710677, %v546_v63  ;;  %v863_v11 = vmul.f32 0.70710677, %v291_v2  ;;  %2281 = verf.f32 %v861_v4  ;;  %v2835_v38 = vmul.f32 0.5, %v546_v63 }
 0x137   :  { %v551_v7 = vpop.f32.mrb[4].mxu1  ;;  %v296_v8 = vpop.f32.mrb[5].mxu0  ;;  %v295_v12 = vadd.f32 %v294_v3, %v2806_v44  ;;  %v865_v14 = vmul.f32 0.70710677, %v548_v5  ;;  %2283 = verf.f32 %v862_v6  ;;  %v2837_v40 = vmul.f32 0.5, %v291_v2 }
 0x138   :  { %v553_v10 = vpop.f32.mrb[5].mxu1  ;;  %v552_v15 = vadd.f32 %v551_v7, %v2808_v46  ;;  %v297_v18 = vadd.f32 %v296_v8, %v2810_v48  ;;  %2285 = verf.f32 %v864_v9  ;;  %v2840_v45 = vmul.f32 0.5, %v548_v5 }
 0x139   :  { %v554_v20 = vadd.f32 %v553_v10, %v2813_v51  ;;  %2287 = verf.f32 %v863_v11  ;;  %v866_v21 = vmul.f32 0.70710677, %v295_v12  ;;  %v2844_v53 = vmul.f32 0.5, %v295_v12 }
 0x13a   :  { %v300_v13 = vpop.f32.mrb[6].mxu0  ;;  %2289 = verf.f32 %v865_v14  ;;  %v868_v24 = vmul.f32 0.70710677, %v552_v15  ;;  %v867_v31 = vmul.f32 0.70710677, %v297_v18  ;;  %v2848_v57 = vmul.f32 0.5, %v552_v15 }
 0x13b   :  { %v557_v16 = vpop.f32.mrb[6].mxu1  ;;  %v302_v17 = vpop.f32.mrb[7].mxu0  ;;  %v301_v25 = vadd.f32 %v300_v13, %v2806_v44  ;;  %v869_v36 = vmul.f32 0.70710677, %v554_v20  ;;  %2291 = verf.f32 %v866_v21  ;;  %v2850_v58 = vmul.f32 0.5, %v297_v18 }
 0x13c   :  { %v559_v19 = vpop.f32.mrb[7].mxu1  ;;  %v558_v32 = vadd.f32 %v557_v16, %v2808_v46  ;;  %v303_v37 = vadd.f32 %v302_v17, %v2810_v48  ;;  %2293 = verf.f32 %v868_v24  ;;  %v2852_v61 = vmul.f32 0.5, %v554_v20 }
 0x13d   :  { %v2276_v28 = vpop.eup %2275  ;;  %v560_v41 = vadd.f32 %v559_v19, %v2813_v51  ;;  %v870_v47 = vmul.f32 0.70710677, %v301_v25  ;;  %2295 = verf.f32 %v867_v31  ;;  %v2854_v62 = vmul.f32 0.5, %v301_v25 }
 0x13e   :  { %v306_v22 = vpop.f32.mrb[8].mxu0  ;;  %v2278_v34 = vpop.eup %2277  ;;  %v1114_v43 = vadd.f32 1.0, %v2276_v28  ;;  %v872_v54 = vmul.f32 0.70710677, %v558_v32  ;;  %2297 = verf.f32 %v869_v36  ;;  %v871_v59 = vmul.f32 0.70710677, %v303_v37 }
 0x13f   :  { %v563_v26 = vpop.f32.mrb[8].mxu1  ;;  %v308_v27 = vpop.f32.mrb[9].mxu0  ;;  %v1116_v52 = vadd.f32 1.0, %v2278_v34  ;;  %v873_v63 = vmul.f32 0.70710677, %v560_v41  ;;  %v307_v1 = vadd.f32 %v306_v22, %v2806_v44  ;;  %2299 = verf.f32 %v870_v47 }
 0x140   :  { %v565_v33 = vpop.f32.mrb[9].mxu1  ;;  %v2280_v50 = vpop.eup %2279  ;;  %v1242_v4 = vmul.f32 %v1114_v43, %v730_v23  ;;  %v564_v6 = vadd.f32 %v563_v26, %v2808_v46  ;;  %v2862_v11 = vmul.f32 0.5, %v558_v32  ;;  %2301 = verf.f32 %v872_v54 }
 0x141   :  { %v2282_v56 = vpop.eup %2281  ;;  %v1115_v5 = vadd.f32 1.0, %v2280_v50  ;;  %v1244_v10 = vmul.f32 %v1116_v52, %v732_v29  ;;  %v309_v12 = vadd.f32 %v308_v27, %v2810_v48  ;;  %v2867_v16 = vmul.f32 0.5, %v303_v37 }
 0x142   :  { %v312_v42 = vpop.f32.mrb[10].mxu0  ;;  %v2284_v60 = vpop.eup %2283  ;;  %v1117_v15 = vadd.f32 1.0, %v2282_v56  ;;  %2303 = verf.f32 %v871_v59  ;;  %v566_v17 = vadd.f32 %v565_v33, %v2813_v51  ;;  %v2870_v18 = vmul.f32 0.5, %v560_v41 }
 0x143   :  { %v569_v0 = vpop.f32.mrb[10].mxu1  ;;  %v2842_v49 = vpop.f32.mrb[11].mxu0  ;;  %2305 = verf.f32 %v873_v63  ;;  %v874_v19 = vmul.f32 0.70710677, %v307_v1  ;;  %v313_v20 = vadd.f32 %v312_v42, %v2806_v44  ;;  %v1118_v22 = vadd.f32 1.0, %v2284_v60 }
 0x144   :  { %v2846_v55 = vpop.f32.mrb[11].mxu1  ;;  %v2286_v3 = vpop.eup %2285  ;;  %v876_v24 = vmul.f32 0.70710677, %v564_v6  ;;  %v1243_v25 = vmul.f32 %v1115_v5, %v2827_v30  ;;  %v2880_v32 = vmul.f32 0.5, %v307_v1  ;;  %v875_v33 = vmul.f32 0.70710677, %v309_v12 }
 0x145   :  { %v2288_v9 = vpop.eup %2287  ;;  %v1120_v29 = vadd.f32 1.0, %v2286_v3  ;;  %v2884_v37 = vmul.f32 0.5, %v564_v6  ;;  %v877_v41 = vmul.f32 0.70710677, %v566_v17  ;;  %v570_v42 = vadd.f32 %v569_v0, %v2808_v46 }
 0x146   :  { %v318_v2 = vpop.f32.mrb[12].mxu0  ;;  %v2290_v14 = vpop.eup %2289  ;;  %v1119_v23 = vadd.f32 1.0, %v2288_v9  ;;  %1530 = vmatprep.mubr.f32.mxu0 %v1243_v25  ;;  %v1245_v30 = vmul.f32 %v1117_v15, %v2830_v39  ;;  %2307 = verf.f32 %v874_v19  ;;  %v2888_v47 = vmul.f32 0.5, %v309_v12 }
 0x147   :  { %v2858_v7 = vpop.f32.mrb[12].mxu1  ;;  %v2860_v8 = vpop.f32.mrb[13].mxu0  ;;  %v1121_v31 = vadd.f32 1.0, %v2290_v14  ;;  %v878_v50 = vmul.f32 0.70710677, %v313_v20  ;;  %v315_v52 = vadd.f32 %v2842_v49, %v2810_v48  ;;  %1531 = vmatmul.mubr.f32.vlgmr.msra.gmra.mrb[64].mxu0 %v1242_v4  ;;  %2309 = verf.f32 %v876_v24 }
 0x148   :  { %v2865_v13 = vpop.f32.mrb[13].mxu1  ;;  %v2292_v28 = vpop.eup %2291  ;;  %v572_v0 = vadd.f32 %v2846_v55, %v2813_v51  ;;  %1755 = vmatprep.mubr.f32.mxu1 %v1245_v30  ;;  %v1247_v39 = vmul.f32 %v1119_v23, %v2837_v40  ;;  %2311 = verf.f32 %v875_v33  ;;  %v2905_v49 = vmul.f32 0.5, %v566_v17 }
 0x149   :  { %v2294_v36 = vpop.eup %2293  ;;  %v2894_v59 = vadd.f32 1.0, %v2292_v28  ;;  %1756 = vmatmul.mubr.f32.vlgmr.msra.gmra.mrb[64].mxu1 %v1244_v10  ;;  %v319_v3 = vadd.f32 %v318_v2, %v2806_v44  ;;  %2313 = verf.f32 %v877_v41  ;;  %v2910_v55 = vmul.f32 0.5, %v313_v20 }
 0x14a   :  { %v2873_v21 = vpop.f32.mrb[14].mxu0  ;;  %v2296_v43 = vpop.eup %2295  ;;  %v2903_v1 = vadd.f32 1.0, %v2294_v36  ;;  %v880_v40 = vmul.f32 0.70710677, %v570_v42  ;;  %1535 = vmatprep.mubr.f32.mxu0 %v1247_v39  ;;  %2315 = verf.f32 %v878_v50  ;;  %v879_v14 = vmul.f32 0.70710677, %v315_v52 }
 0x14b   :  { %v2876_v26 = vpop.f32.mrb[14].mxu1  ;;  %v2878_v27 = vpop.f32.mrb[15].mxu0  ;;  %v1123_v6 = vadd.f32 1.0, %v2296_v43  ;;  %v1249_v15 = vmul.f32 %v1121_v31, %v2840_v45  ;;  %v881_v19 = vmul.f32 0.70710677, %v572_v0  ;;  %v576_v2 = vadd.f32 %v2858_v7, %v2808_v46 }
 0x14c   :  { %v2882_v34 = vpop.f32.mrb[15].mxu1  ;;  %v2298_v56 = vpop.eup %2297  ;;  %v1246_v23 = vmul.f32 %v1118_v22, %v2832_v35  ;;  %v1248_v20 = vmul.f32 %v1120_v29, %v2835_v38  ;;  %v2925_v36 = vmul.f32 0.5, %v570_v42  ;;  %v882_v45 = vmul.f32 0.70710677, %v319_v3 }
 0x14d   :  { %v2300_v5 = vpop.eup %2299  ;;  %v1125_v12 = vadd.f32 1.0, %v2298_v56  ;;  %v321_v31 = vadd.f32 %v2860_v8, %v2810_v48  ;;  %1760 = vmatprep.mubr.f32.mxu1 %v1249_v15  ;;  %2317 = verf.f32 %v880_v40  ;;  %v2931_v35 = vmul.f32 0.5, %v315_v52 }
 0x14e   :  { %v2892_v54 = vpop.f32.mrb[16].mxu0  ;;  %v2302_v9 = vpop.eup %2301  ;;  %v2923_v33 = vadd.f32 1.0, %v2300_v5  ;;  %v2933_v38 = vmul.f32 0.5, %v572_v0  ;;  %v578_v7 = vadd.f32 %v2865_v13, %v2813_v51  ;;  %1536 = vmatmul.mubr.f32.gmra.mrb[66].mxu0 %v1246_v23  ;;  %1761 = vmatmul.mubr.f32.gmra.mrb[66].mxu1 %v1248_v20  ;;  %2319 = verf.f32 %v879_v14 }
 0x14f   :  { %v2899_v60 = vpop.f32.mrb[16].mxu1  ;;  %v2901_v63 = vpop.f32.mrb[17].mxu0  ;;  %v2937_v22 = vadd.f32 1.0, %v2302_v9  ;;  %v2941_v8 = vadd.f32 %v2873_v21, %v2806_v44  ;;  %2321 = verf.f32 %v881_v19  ;;  %v2945_v43 = vmul.f32 0.5, %v319_v3 }
 0x150   :  { %v2908_v4 = vpop.f32.mrb[17].mxu1  ;;  %v2304_v10 = vpop.eup %2303  ;;  %v884_v50 = vmul.f32 0.70710677, %v576_v2  ;;  %2323 = verf.f32 %v882_v45  ;;  %v883_v13 = vmul.f32 0.70710677, %v321_v31  ;;  %v582_v56 = vadd.f32 %v2876_v26, %v2808_v46 }
 0x151   :  { %v2306_v28 = vpop.eup %2305  ;;  %v1127_v29 = vadd.f32 1.0, %v2304_v10  ;;  %v1251_v0 = vmul.f32 %v1123_v6, %v2850_v58  ;;  %v885_v40 = vmul.f32 0.70710677, %v578_v7  ;;  %v2956_v9 = vadd.f32 %v2878_v27, %v2810_v48 }
 0x152   :  { %v2913_v17 = vpop.f32.mrb[18].mxu0  ;;  %v1129_v30 = vadd.f32 1.0, %v2306_v28  ;;  %v2308_v52 = vpop.eup %2307  ;;  %v1253_v3 = vmul.f32 %v1125_v12, %v2852_v61  ;;  %v1250_v14 = vmul.f32 %v2894_v59, %v2844_v53  ;;  %v2963_v10 = vmul.f32 0.5, %v576_v2 }
 0x153   :  { %v2919_v24 = vpop.f32.mrb[18].mxu1  ;;  %v2921_v25 = vpop.f32.mrb[19].mxu0  ;;  %v886_v58 = vmul.f32 0.70710677, %v2941_v8  ;;  %v584_v6 = vadd.f32 %v2882_v34, %v2813_v51  ;;  %1540 = vmatprep.mubr.f32.mxu0 %v1251_v0  ;;  %v1252_v27 = vmul.f32 %v2903_v1, %v2848_v57  ;;  %2325 = verf.f32 %v884_v50 }
 0x154   :  { %v2929_v41 = vpop.f32.mrb[19].mxu1  ;;  %v2310_v21 = vpop.eup %2309  ;;  %v2972_v12 = vmul.f32 0.5, %v321_v31  ;;  %v2974_v53 = vmul.f32 0.5, %v578_v7  ;;  %1765 = vmatprep.mubr.f32.mxu1 %v1253_v3  ;;  %1541 = vmatmul.mubr.f32.gmra.mrb[68].mxu0 %v1250_v14  ;;  %v331_v59 = vadd.f32 %v2892_v54, %v2806_v44  ;;  %2327 = verf.f32 %v883_v13 }
 0x155   :  { %v2312_v26 = vpop.eup %2311  ;;  %v888_v57 = vmul.f32 0.70710677, %v582_v56  ;;  %1766 = vmatmul.mubr.f32.gmra.mrb[68].mxu1 %v1252_v27  ;;  %v1255_v1 = vmul.f32 %v1127_v29, %v2867_v16  ;;  %v1257_v20 = vmul.f32 %v1129_v30, %v2870_v18  ;;  %v1130_v45 = vadd.f32 1.0, %v2308_v52 }
 0x156   :  { %v2943_v42 = vpop.f32.mrb[20].mxu0  ;;  %v2314_v61 = vpop.eup %2313  ;;  %v1131_v31 = vadd.f32 1.0, %v2312_v26  ;;  %2329 = verf.f32 %v885_v40  ;;  %v887_v7 = vmul.f32 0.70710677, %v2956_v9  ;;  %v889_v50 = vmul.f32 0.70710677, %v584_v6 }
 0x157   :  { %v2950_v39 = vpop.f32.mrb[20].mxu1  ;;  %v2952_v5 = vpop.f32.mrb[21].mxu0  ;;  %v1133_v54 = vadd.f32 1.0, %v2314_v61  ;;  %2331 = verf.f32 %v886_v58  ;;  %v588_v0 = vadd.f32 %v2899_v60, %v2808_v46  ;;  %1545 = vmatprep.mubr.f32.mxu0 %v1255_v1  ;;  %1770 = vmatprep.mubr.f32.mxu1 %v1257_v20  ;;  %v1132_v29 = vadd.f32 1.0, %v2310_v21 }
 0x158   :  { %v2961_v15 = vpop.f32.mrb[21].mxu1  ;;  %v2316_v23 = vpop.eup %2315  ;;  %v890_v18 = vmul.f32 0.70710677, %v331_v59  ;;  %v333_v30 = vadd.f32 %v2901_v63, %v2810_v48  ;;  %v1254_v52 = vmul.f32 %v2923_v33, %v2854_v62  ;;  %2333 = verf.f32 %v888_v57 }
 0x159   :  { %v2318_v16 = vpop.eup %2317  ;;  %v2999_v26 = vadd.f32 1.0, %v2316_v23  ;;  %v590_v60 = vadd.f32 %v2908_v4, %v2813_v51  ;;  %v1256_v21 = vmul.f32 %v2937_v22, %v2862_v11  ;;  %v3008_v27 = vmul.f32 0.5, %v2941_v8 }
 0x15a   :  { %v2970_v19 = vpop.f32.mrb[22].mxu0  ;;  %v2320_v14 = vpop.eup %2319  ;;  %v3010_v62 = vmul.f32 0.5, %v582_v56  ;;  %2335 = verf.f32 %v887_v7  ;;  %1546 = vmatmul.mubr.f32.gmra.mrb[70].mxu0 %v1254_v52  ;;  %v337_v33 = vadd.f32 %v2913_v17, %v2806_v44  ;;  %v892_v23 = vmul.f32 0.70710677, %v588_v0 }
 0x15b   :  { %v2978_v2 = vpop.f32.mrb[22].mxu1  ;;  %v2980_v34 = vpop.f32.mrb[23].mxu0  ;;  %2337 = verf.f32 %v889_v50  ;;  %1771 = vmatmul.mubr.f32.gmra.mrb[70].mxu1 %v1256_v21  ;;  %v1259_v4 = vmul.f32 %v1131_v31, %v2888_v47  ;;  %v1261_v11 = vmul.f32 %v1133_v54, %v2905_v49  ;;  %v3019_v8 = vmul.f32 0.5, %v2956_v9 }
 0x15c   :  { %v2984_v28 = vpop.f32.mrb[23].mxu1  ;;  %v2322_v63 = vpop.eup %2321  ;;  %v3021_v56 = vmul.f32 0.5, %v584_v6  ;;  %2339 = verf.f32 %v890_v18  ;;  %v891_v57 = vmul.f32 0.70710677, %v333_v30  ;;  %v1135_v17 = vadd.f32 1.0, %v2320_v14 }
 0x15d   :  { %v2324_v61 = vpop.eup %2323  ;;  %v1137_v20 = vadd.f32 1.0, %v2322_v63  ;;  %v893_v7 = vmul.f32 0.70710677, %v590_v60  ;;  %v594_v50 = vadd.f32 %v2919_v24, %v2808_v46  ;;  %1550 = vmatprep.mubr.f32.mxu0 %v1259_v4  ;;  %1775 = vmatprep.mubr.f32.mxu1 %v1261_v11  ;;  %v1136_v31 = vadd.f32 1.0, %v2318_v16 }
 0x15e   :  { %v2989_v13 = vpop.f32.mrb[24].mxu0  ;;  %v2326_v9 = vpop.eup %2325  ;;  %v3031_v6 = vmul.f32 0.5, %v331_v59  ;;  %v894_v54 = vmul.f32 0.70710677, %v337_v33  ;;  %v1258_v18 = vmul.f32 %v1130_v45, %v2880_v32  ;;  %v3034_v14 = vadd.f32 1.0, %v2324_v61 }
 0x15f   :  { %v2995_v40 = vpop.f32.mrb[24].mxu1  ;;  %v2997_v3 = vpop.f32.mrb[25].mxu0  ;;  %2341 = verf.f32 %v892_v23  ;;  %v339_v24 = vadd.f32 %v2921_v25, %v2810_v48  ;;  %v1260_v21 = vmul.f32 %v1132_v29, %v2884_v37  ;;  %v3041_v11 = vmul.f32 0.5, %v588_v0 }
 0x160   :  { %v3005_v58 = vpop.f32.mrb[25].mxu1  ;;  %v2328_v52 = vpop.eup %2327  ;;  %v3043_v16 = vmul.f32 0.5, %v333_v30  ;;  %2343 = verf.f32 %v891_v57  ;;  %v596_v32 = vadd.f32 %v2929_v41, %v2813_v51  ;;  %1551 = vmatmul.mubr.f32.gmra.mrb[72].mxu0 %v1258_v18  ;;  %v896_v25 = vmul.f32 0.70710677, %v594_v50 }
 0x161   :  { %v2330_v4 = vpop.eup %2329  ;;  %2345 = verf.f32 %v893_v7  ;;  %1776 = vmatmul.mubr.f32.gmra.mrb[72].mxu1 %v1260_v21  ;;  %v1263_v37 = vmul.f32 %v1135_v17, %v2931_v35  ;;  %v1265_v0 = vmul.f32 %v1137_v20, %v2933_v38  ;;  %v1140_v30 = vadd.f32 1.0, %v2326_v9 }
 0x162   :  { %v3016_v22 = vpop.f32.mrb[26].mxu0  ;;  %v2332_v61 = vpop.eup %2331  ;;  %v3055_v23 = vmul.f32 0.5, %v590_v60  ;;  %2347 = verf.f32 %v894_v54  ;;  %v343_v41 = vadd.f32 %v2943_v42, %v2806_v44  ;;  %v1139_v18 = vadd.f32 1.0, %v2328_v52 }
 0x163   :  { %v3023_v1 = vpop.f32.mrb[26].mxu1  ;;  %v3027_v47 = vpop.f32.mrb[27].mxu0  ;;  %v895_v7 = vmul.f32 0.70710677, %v339_v24  ;;  %1555 = vmatprep.mubr.f32.mxu0 %v1263_v37  ;;  %1780 = vmatprep.mubr.f32.mxu1 %v1265_v0  ;;  %v3063_v17 = vadd.f32 1.0, %v2332_v61  ;;  %v600_v60 = vadd.f32 %v2950_v39, %v2808_v46  ;;  %v1262_v42 = vmul.f32 %v2999_v26, %v2910_v55 }
 0x164   :  { %v3029_v49 = vpop.f32.mrb[27].mxu1  ;;  %v2334_v57 = vpop.eup %2333  ;;  %v897_v20 = vmul.f32 0.70710677, %v596_v32  ;;  %v3073_v52 = vmul.f32 0.5, %v594_v50  ;;  %2349 = verf.f32 %v896_v25  ;;  %v345_v21 = vadd.f32 %v2952_v5, %v2810_v48 }
 0x165   :  { %v2336_v38 = vpop.eup %2335  ;;  %v3080_v39 = vadd.f32 1.0, %v2334_v57  ;;  %v3082_v0 = vmul.f32 0.5, %v339_v24  ;;  %v898_v55 = vmul.f32 0.70710677, %v343_v41  ;;  %v602_v26 = vadd.f32 %v2961_v15, %v2813_v51  ;;  %1556 = vmatmul.mubr.f32.gmra.mrb[74].mxu0 %v1262_v42 }
 0x166   :  { %v3039_v63 = vpop.f32.mrb[28].mxu0  ;;  %2351 = verf.f32 %v895_v7  ;;  %v3086_v50 = vmul.f32 0.5, %v596_v32  ;;  %v1267_v5 = vmul.f32 %v1139_v18, %v2972_v12  ;;  %v1143_v25 = vadd.f32 1.0, %v2336_v38 }
 0x167   :  { %v3047_v59 = vpop.f32.mrb[28].mxu1  ;;  %v3049_v45 = vpop.f32.mrb[29].mxu0  ;;  %2353 = verf.f32 %v897_v20  ;;  %v900_v24 = vmul.f32 0.70710677, %v600_v60  ;;  %v3096_v15 = vmul.f32 0.5, %v343_v41  ;;  %v349_v7 = vadd.f32 %v2970_v19, %v2806_v44 }
 0x168   :  { %3816 = vst [vmem:[#allocation13_spill] sm:$0xff] %v3047_v59  ;;  %3817 = vst [vmem:[#allocation14_spill] sm:$0xff] %v3049_v45  ;;  %v3053_v29 = vpop.f32.mrb[29].mxu1  ;;  %v1141_v45 = vadd.f32 1.0, %v2330_v4  ;;  %v3059_v59 = vmul.f32 0.5, %v337_v33  ;;  %v2338_v33 = vpop.eup %2337  ;;  %v1264_v4 = vmul.f32 %v1136_v31, %v2925_v36  ;;  %1560 = vmatprep.mubr.f32.mxu0 %v1267_v5  ;;  %2355 = verf.f32 %v898_v55 }
 0x169   :  { %v2340_v37 = vpop.eup %2339  ;;  %v1145_v57 = vadd.f32 1.0, %v2338_v33  ;;  %v899_v32 = vmul.f32 0.70710677, %v345_v21  ;;  %v901_v18 = vmul.f32 0.70710677, %v602_v26  ;;  %v606_v38 = vadd.f32 %v2978_v2, %v2808_v46 }
 0x16a   :  { %v3061_v35 = vpop.f32.mrb[30].mxu0  ;;  %1781 = vmatmul.mubr.f32.gmra.mrb[74].mxu1 %v1264_v4  ;;  %v1269_v36 = vmul.f32 %v1141_v45, %v2974_v53  ;;  %v1266_v41 = vmul.f32 %v3034_v14, %v2945_v43  ;;  %v3108_v42 = vmul.f32 0.5, %v600_v60  ;;  %v3110_v33 = vmul.f32 0.5, %v345_v21 }
 0x16b   :  { %v3069_v9 = vpop.f32.mrb[30].mxu1  ;;  %v3071_v54 = vpop.f32.mrb[31].mxu0  ;;  %v351_v19 = vadd.f32 %v2980_v34, %v2810_v48  ;;  %v1268_v4 = vmul.f32 %v1140_v30, %v2963_v10  ;;  %2357 = verf.f32 %v900_v24  ;;  %v3119_v2 = vmul.f32 0.5, %v602_v26 }
 0x16c   :  { %3818 = vst [vmem:[#allocation15_spill] sm:$0xff] %v3069_v9  ;;  %3819 = vst [vmem:[#allocation16_spill] sm:$0xff] %v3071_v54  ;;  %v3078_v61 = vpop.f32.mrb[31].mxu1  ;;  %v2342_v54 = vpop.eup %2341  ;;  %v3094_v9 = vadd.f32 1.0, %v2340_v37  ;;  %1785 = vmatprep.mubr.f32.mxu1 %v1269_v36  ;;  %v608_v43 = vadd.f32 %v2984_v28, %v2813_v51  ;;  %1561 = vmatmul.mubr.f32.gmra.mrb[76].mxu0 %v1266_v41  ;;  %2359 = verf.f32 %v899_v32  ;;  %v902_v34 = vmul.f32 0.70710677, %v349_v7 }
 0x16d   :  { %3820 = vst [vmem:[#allocation17_spill] sm:$0xff] %v3078_v61  ;;  %v2344_v45 = vpop.eup %2343  ;;  %v3117_v5 = vadd.f32 1.0, %v2342_v54  ;;  %v1271_v10 = vmul.f32 %v1143_v25, %v3019_v8  ;;  %v1273_v30 = vmul.f32 %v1145_v57, %v3021_v56  ;;  %2361 = verf.f32 %v901_v18 }
 0x16e   :  { %v3090_v31 = vpop.f32.mrb[32].mxu0  ;;  %v2346_v20 = vpop.eup %2345  ;;  %1786 = vmatmul.mubr.f32.gmra.mrb[76].mxu1 %v1268_v4  ;;  %v1147_v21 = vadd.f32 1.0, %v2344_v45  ;;  %v904_v26 = vmul.f32 0.70710677, %v606_v38  ;;  %v355_v28 = vadd.f32 %v2989_v13, %v2806_v44  ;;  %v903_v32 = vmul.f32 0.70710677, %v351_v19 }
 0x16f   :  { %v3092_v61 = vpop.f32.mrb[32].mxu1  ;;  %v3100_v12 = vpop.f32.mrb[33].mxu0  ;;  %v1149_v24 = vadd.f32 1.0, %v2346_v20  ;;  %1565 = vmatprep.mubr.f32.mxu0 %v1271_v10  ;;  %1790 = vmatprep.mubr.f32.mxu1 %v1273_v30  ;;  %v3139_v56 = vmul.f32 0.5, %v606_v38  ;;  %v905_v25 = vmul.f32 0.70710677, %v608_v43  ;;  %v612_v57 = vadd.f32 %v2995_v40, %v2808_v46 }
 0x170   :  { %v3102_v53 = vpop.f32.mrb[33].mxu1  ;;  %v2348_v55 = vpop.eup %2347  ;;  %v1270_v13 = vmul.f32 %v3063_v17, %v3008_v27  ;;  %2363 = verf.f32 %v902_v34  ;;  %v3149_v20 = vmul.f32 0.5, %v351_v19  ;;  %v357_v4 = vadd.f32 %v2997_v3, %v2810_v48 }
 0x171   :  { %v2350_v36 = vpop.eup %2349  ;;  %v3133_v41 = vadd.f32 1.0, %v2348_v55  ;;  %v1272_v38 = vmul.f32 %v3080_v39, %v3010_v62  ;;  %2365 = verf.f32 %v904_v26  ;;  %v906_v27 = vmul.f32 0.70710677, %v355_v28 }
 0x172   :  { %v3115_v37 = vpop.f32.mrb[34].mxu0  ;;  %v3157_v10 = vadd.f32 1.0, %v2350_v36  ;;  %v614_v17 = vadd.f32 %v3005_v58, %v2813_v51  ;;  %1566 = vmatmul.mubr.f32.gmra.mrb[78].mxu0 %v1270_v13  ;;  %2367 = verf.f32 %v903_v32  ;;  %v361_v19 = vadd.f32 %v3016_v22, %v2806_v44 }
 0x173   :  { %v3123_v14 = vpop.f32.mrb[34].mxu1  ;;  %v3125_v60 = vpop.f32.mrb[35].mxu0  ;;  %1791 = vmatmul.mubr.f32.gmra.mrb[78].mxu1 %v1272_v38  ;;  %v1275_v3 = vmul.f32 %v1147_v21, %v3043_v16  ;;  %v1277_v62 = vmul.f32 %v1149_v24, %v3055_v23  ;;  %v3167_v36 = vmul.f32 0.5, %v608_v43  ;;  %2369 = verf.f32 %v905_v25 }
 0x174   :  { %3821 = vst [vmem:[#allocation18_spill] sm:$0xff] %v3125_v60  ;;  %v3129_v54 = vpop.f32.mrb[35].mxu1  ;;  %v3135_v60 = vmul.f32 0.5, %v349_v7  ;;  %v2352_v7 = vpop.eup %2351  ;;  %v908_v26 = vmul.f32 0.70710677, %v612_v57  ;;  %v3171_v32 = vmul.f32 0.5, %v355_v28  ;;  %v618_v22 = vadd.f32 %v3023_v1, %v2808_v46 }
 0x175   :  { %v2354_v40 = vpop.eup %2353  ;;  %v1151_v30 = vadd.f32 1.0, %v2352_v7  ;;  %v907_v13 = vmul.f32 0.70710677, %v357_v4  ;;  %1570 = vmatprep.mubr.f32.mxu0 %v1275_v3  ;;  %1795 = vmatprep.mubr.f32.mxu1 %v1277_v62  ;;  %2371 = verf.f32 %v906_v27  ;;  %v909_v43 = vmul.f32 0.70710677, %v614_v17 }
 0x176   :  { %v3137_v8 = vpop.f32.mrb[36].mxu0  ;;  %v2356_v34 = vpop.eup %2355  ;;  %v1153_v58 = vadd.f32 1.0, %v2354_v40  ;;  %v363_v24 = vadd.f32 %v3027_v47, %v2810_v48  ;;  %v1274_v28 = vmul.f32 %v3094_v9, %v3031_v6  ;;  %v910_v38 = vmul.f32 0.70710677, %v361_v19 }
 0x177   :  { %v3145_v45 = vpop.f32.mrb[36].mxu1  ;;  %v3147_v18 = vpop.f32.mrb[37].mxu0  ;;  %v3183_v7 = vadd.f32 1.0, %v2356_v34  ;;  %v3187_v1 = vadd.f32 %v3029_v49, %v2813_v51  ;;  %v1276_v40 = vmul.f32 %v3117_v5, %v3041_v11  ;;  %v3193_v62 = vmul.f32 0.5, %v612_v57 }
 0x178   :  { %v3155_v55 = vpop.f32.mrb[37].mxu1  ;;  %v2358_v21 = vpop.eup %2357  ;;  %2373 = verf.f32 %v908_v26  ;;  %v3195_v47 = vmul.f32 0.5, %v357_v4  ;;  %1571 = vmatmul.mubr.f32.gmra.mrb[80].mxu0 %v1274_v28  ;;  %v367_v6 = vadd.f32 %v3039_v63, %v2806_v44  ;;  %v912_v49 = vmul.f32 0.70710677, %v618_v22 }
 0x179   :  { %3822 = vst [vmem:[#allocation19_spill] sm:$0xff] %v3155_v55  ;;  %v2360_v25 = vpop.eup %2359  ;;  %2375 = verf.f32 %v907_v13  ;;  %1796 = vmatmul.mubr.f32.gmra.mrb[80].mxu1 %v1276_v40  ;;  %v1279_v11 = vmul.f32 %v1151_v30, %v3082_v0  ;;  %v1281_v5 = vmul.f32 %v1153_v58, %v3086_v50  ;;  %v1156_v26 = vadd.f32 1.0, %v2358_v21  ;;  %v3828_v58 = vld [vmem:[#allocation14_spill] sm:$0xff] }
 0x17a   :  { %v3165_v39 = vpop.f32.mrb[38].mxu0  ;;  %v2362_v27 = vpop.eup %2361  ;;  %v1155_v4 = vadd.f32 1.0, %v2360_v25  ;;  %2377 = verf.f32 %v909_v43  ;;  %v911_v28 = vmul.f32 0.70710677, %v363_v24  ;;  %v913_v63 = vmul.f32 0.70710677, %v3187_v1 }
 0x17b   :  { %v3169_v55 = vpop.f32.mrb[38].mxu1  ;;  %v3175_v16 = vpop.f32.mrb[39].mxu0  ;;  %2379 = verf.f32 %v910_v38  ;;  %1575 = vmatprep.mubr.f32.mxu0 %v1279_v11  ;;  %1800 = vmatprep.mubr.f32.mxu1 %v1281_v5  ;;  %v3212_v50 = vmul.f32 0.5, %v614_v17  ;;  %v914_v30 = vmul.f32 0.70710677, %v367_v6  ;;  %v369_v21 = vadd.f32 %v3828_v58, %v2810_v48 }
 0x17c   :  { %v3177_v23 = vpop.f32.mrb[39].mxu1  ;;  %v1278_v43 = vmul.f32 %v3133_v41, %v3059_v59  ;;  %2381 = verf.f32 %v912_v49  ;;  %v626_v11 = vadd.f32 %v3053_v29, %v2813_v51  ;;  %v1280_v17 = vmul.f32 %v3157_v10, %v3073_v52 }
 0x17d   :  { %3823 = vst [vmem:[#allocation20_spill] sm:$0xff] %v3177_v23  ;;  %v1157_v23 = vadd.f32 1.0, %v2362_v27  ;;  %v3232_v59 = vmul.f32 0.5, %v618_v22  ;;  %2383 = verf.f32 %v911_v28  ;;  %v373_v41 = vadd.f32 %v3061_v35, %v2806_v44 }
 0x17e   :  { %v3191_v3 = vpop.f32.mrb[40].mxu0  ;;  %1576 = vmatmul.mubr.f32.gmra.mrb[82].mxu0 %v1278_v43  ;;  %2385 = verf.f32 %v913_v63  ;;  %1801 = vmatmul.mubr.f32.gmra.mrb[82].mxu1 %v1280_v17  ;;  %v1283_v29 = vmul.f32 %v1155_v4, %v3110_v33  ;;  %v915_v22 = vmul.f32 0.70710677, %v369_v21  ;;  %v917_v35 = vmul.f32 0.70710677, %v626_v11  ;;  %v3832_v63 = vld [vmem:[#allocation15_spill] sm:$0xff] }
 0x17f   :  { %3824 = vst [vmem:[#allocation21_spill] sm:$0xff] %v3191_v3  ;;  %v3199_v9 = vpop.f32.mrb[40].mxu1  ;;  %v3201_v34 = vpop.f32.mrb[41].mxu0  ;;  %v1285_v49 = vmul.f32 %v1157_v23, %v3119_v2  ;;  %2387 = verf.f32 %v914_v30  ;;  %v630_v17 = vadd.f32 %v3832_v63, %v2808_v46  ;;  %v3253_v4 = vmul.f32 0.5, %v367_v6 }
 0x180   :  { %3825 = vst [vmem:[#allocation22_spill] sm:$0xff] %v3201_v34  ;;  %v3205_v57 = vpop.f32.mrb[41].mxu1  ;;  %v2364_v3 = vpop.eup %2363  ;;  %v3826_v34 = vld [vmem:[#allocation13_spill] sm:$0xff]  ;;  %1580 = vmatprep.mubr.f32.mxu0 %v1283_v29  ;;  %v1282_v30 = vmul.f32 %v3183_v7, %v3096_v15  ;;  %v3835_v29 = vld [vmem:[#allocation16_spill] sm:$0xff]  ;;  %v1284_v63 = vmul.f32 %v1156_v26, %v3108_v42  ;;  %v3266_v6 = vmul.f32 0.5, %v369_v21 }
 0x181   :  { %v624_v13 = vadd.f32 %v3826_v34, %v2808_v46  ;;  %v2366_v0 = vpop.eup %2365  ;;  %v3222_v34 = vmul.f32 0.5, %v361_v19  ;;  %1805 = vmatprep.mubr.f32.mxu1 %v1285_v49  ;;  %v375_v49 = vadd.f32 %v3835_v29, %v2810_v48  ;;  %v920_v29 = vmul.f32 0.70710677, %v630_v17 }
 0x182   :  { %v3210_v40 = vpop.f32.mrb[42].mxu0  ;;  %v2368_v27 = vpop.eup %2367  ;;  %1581 = vmatmul.mubr.f32.gmra.mrb[84].mxu0 %v1282_v30  ;;  %1806 = vmatmul.mubr.f32.gmra.mrb[84].mxu1 %v1284_v63 }
 0x183   :  { %3827 = vst [vmem:[#allocation13_spill] sm:$0xff] %v3210_v40  ;;  %v3218_v25 = vpop.f32.mrb[42].mxu1  ;;  %v3220_v38 = vpop.f32.mrb[43].mxu0  ;;  %v3230_v40 = vadd.f32 1.0, %v2364_v3  ;;  %v916_v19 = vmul.f32 0.70710677, %v624_v13 }
 0x184   :  { %3829 = vst [vmem:[#allocation14_spill] sm:$0xff] %v3220_v38  ;;  %v3228_v5 = vpop.f32.mrb[43].mxu1  ;;  %v2370_v58 = vpop.eup %2369  ;;  %v3240_v3 = vmul.f32 0.5, %v363_v24  ;;  %v1159_v43 = vadd.f32 1.0, %v2368_v27  ;;  %v3251_v24 = vmul.f32 0.5, %v3187_v1  ;;  %v3264_v1 = vmul.f32 0.5, %v624_v13 }
 0x185   :  { %3830 = vst [vmem:[#allocation23_spill] sm:$0xff] %v3228_v5  ;;  %v2372_v10 = vpop.eup %2371  ;;  %v1160_v5 = vadd.f32 1.0, %v2366_v0  ;;  %v1161_v38 = vadd.f32 1.0, %v2370_v58  ;;  %v918_v0 = vmul.f32 0.70710677, %v373_v41  ;;  %2389 = verf.f32 %v916_v19 }
 0x186   :  { %v3238_v52 = vpop.f32.mrb[44].mxu0  ;;  %v2374_v23 = vpop.eup %2373  ;;  %v3257_v58 = vadd.f32 1.0, %v2372_v10  ;;  %2391 = verf.f32 %v915_v22  ;;  %v1287_v42 = vmul.f32 %v1159_v43, %v3149_v20  ;;  %v3278_v22 = vmul.f32 0.5, %v626_v11 }
 0x187   :  { %v3242_v28 = vpop.f32.mrb[44].mxu1  ;;  %v3246_v33 = vpop.f32.mrb[45].mxu0  ;;  %2393 = verf.f32 %v917_v35  ;;  %v1289_v26 = vmul.f32 %v1161_v38, %v3167_v36  ;;  %v1164_v21 = vadd.f32 1.0, %v2374_v23  ;;  %v919_v35 = vmul.f32 0.70710677, %v375_v49 }
 0x188   :  { %3831 = vst [vmem:[#allocation24_spill] sm:$0xff] %v3242_v28  ;;  %3833 = vst [vmem:[#allocation15_spill] sm:$0xff] %v3246_v33  ;;  %v3248_v2 = vpop.f32.mrb[45].mxu1  ;;  %v2376_v27 = vpop.eup %2375  ;;  %v3837_v28 = vld [vmem:[#allocation17_spill] sm:$0xff]  ;;  %2395 = verf.f32 %v918_v0  ;;  %1585 = vmatprep.mubr.f32.mxu0 %v1287_v42  ;;  %v636_v11 = vadd.f32 %v3092_v61, %v2808_v46  ;;  %v3296_v0 = vmul.f32 0.5, %v630_v17  ;;  %v1288_v63 = vmul.f32 %v1160_v5, %v3139_v56 }
 0x189   :  { %3834 = vst [vmem:[#allocation25_spill] sm:$0xff] %v3248_v2  ;;  %v2378_v33 = vpop.eup %2377  ;;  %v632_v15 = vadd.f32 %v3837_v28, %v2813_v51  ;;  %v379_v28 = vadd.f32 %v3090_v31, %v2806_v44  ;;  %1810 = vmatprep.mubr.f32.mxu1 %v1289_v26  ;;  %v1286_v31 = vmul.f32 %v3230_v40, %v3135_v60  ;;  %2397 = verf.f32 %v920_v29 }
 0x18a   :  { %v3262_v2 = vpop.f32.mrb[46].mxu0  ;;  %v2380_v10 = vpop.eup %2379  ;;  %v3305_v26 = vmul.f32 0.5, %v375_v49  ;;  %v638_v40 = vadd.f32 %v3102_v53, %v2813_v51  ;;  %2399 = verf.f32 %v919_v35  ;;  %1811 = vmatmul.mubr.f32.gmra.mrb[86].mxu1 %v1288_v63  ;;  %v924_v49 = vmul.f32 0.70710677, %v636_v11 }
 0x18b   :  { %3836 = vst [vmem:[#allocation16_spill] sm:$0xff] %v3262_v2  ;;  %v3270_v7 = vpop.f32.mrb[46].mxu1  ;;  %v3272_v19 = vpop.f32.mrb[47].mxu0  ;;  %v3282_v2 = vmul.f32 0.5, %v373_v41  ;;  %v3286_v38 = vadd.f32 1.0, %v2380_v10  ;;  %1586 = vmatmul.mubr.f32.gmra.mrb[86].mxu0 %v1286_v31  ;;  %v3309_v17 = vmul.f32 0.5, %v632_v15  ;;  %v385_v35 = vadd.f32 %v3115_v37, %v2806_v44 }
 0x18c   :  { %3838 = vst [vmem:[#allocation17_spill] sm:$0xff] %v3270_v7  ;;  %3839 = vst [vmem:[#allocation26_spill] sm:$0xff] %v3272_v19  ;;  %v3276_v13 = vpop.f32.mrb[47].mxu1  ;;  %v2382_v30 = vpop.eup %2381  ;;  %v1163_v7 = vadd.f32 1.0, %v2376_v27  ;;  %v1165_v19 = vadd.f32 1.0, %v2378_v33  ;;  %v381_v27 = vadd.f32 %v3100_v12, %v2810_v48  ;;  %v3319_v53 = vmul.f32 0.5, %v379_v28 }
 0x18d   :  { %v2384_v36 = vpop.eup %2383  ;;  %v921_v43 = vmul.f32 0.70710677, %v632_v15  ;;  %v3303_v61 = vadd.f32 1.0, %v2382_v30  ;;  %v922_v60 = vmul.f32 0.70710677, %v379_v28  ;;  %v1290_v28 = vmul.f32 %v3257_v58, %v3171_v32  ;;  %v3843_v37 = vld [vmem:[#allocation18_spill] sm:$0xff] }
 0x18e   :  { %v3284_v20 = vpop.f32.mrb[48].mxu0  ;;  %v2386_v41 = vpop.eup %2385  ;;  %v1291_v12 = vmul.f32 %v1163_v7, %v3195_v47  ;;  %v1293_v56 = vmul.f32 %v1165_v19, %v3212_v50  ;;  %v1167_v29 = vadd.f32 1.0, %v2384_v36  ;;  %v923_v15 = vmul.f32 0.70710677, %v381_v27 }
 0x18f   :  { %v3292_v23 = vpop.f32.mrb[48].mxu1  ;;  %v3294_v33 = vpop.f32.mrb[49].mxu0  ;;  %v1169_v30 = vadd.f32 1.0, %v2386_v41  ;;  %2401 = verf.f32 %v921_v43  ;;  %v925_v19 = vmul.f32 0.70710677, %v638_v40  ;;  %v642_v36 = vadd.f32 %v3123_v14, %v2808_v46 }
 0x190   :  { %3840 = vst [vmem:[#allocation27_spill] sm:$0xff] %v3292_v23  ;;  %3841 = vst [vmem:[#allocation28_spill] sm:$0xff] %v3294_v33  ;;  %v3301_v10 = vpop.f32.mrb[49].mxu1  ;;  %v2388_v42 = vpop.eup %2387  ;;  %1590 = vmatprep.mubr.f32.mxu0 %v1291_v12  ;;  %1815 = vmatprep.mubr.f32.mxu1 %v1293_v56  ;;  %2403 = verf.f32 %v922_v60  ;;  %v3331_v31 = vmul.f32 0.5, %v636_v11  ;;  %v3333_v41 = vmul.f32 0.5, %v381_v27  ;;  %v387_v63 = vadd.f32 %v3843_v37, %v2810_v48 }
 0x191   :  { %3842 = vst [vmem:[#allocation29_spill] sm:$0xff] %v3301_v10  ;;  %v2390_v33 = vpop.eup %2389  ;;  %v3317_v23 = vadd.f32 1.0, %v2388_v42  ;;  %v1292_v42 = vmul.f32 %v1164_v21, %v3193_v62  ;;  %2405 = verf.f32 %v924_v49  ;;  %v3342_v14 = vmul.f32 0.5, %v638_v40  ;;  %1591 = vmatmul.mubr.f32.gmra.mrb[88].mxu0 %v1290_v28 }
 0x192   :  { %v3313_v5 = vpop.f32.mrb[50].mxu0  ;;  %v2392_v7 = vpop.eup %2391  ;;  %v3340_v56 = vadd.f32 1.0, %v2390_v33  ;;  %v644_v32 = vadd.f32 %v3129_v54, %v2813_v51  ;;  %2407 = verf.f32 %v923_v15  ;;  %v926_v27 = vmul.f32 0.70710677, %v385_v35 }
 0x193   :  { %v3315_v10 = vpop.f32.mrb[50].mxu1  ;;  %v3323_v47 = vpop.f32.mrb[51].mxu0  ;;  %1816 = vmatmul.mubr.f32.gmra.mrb[88].mxu1 %v1292_v42  ;;  %v1295_v62 = vmul.f32 %v1167_v29, %v3240_v3  ;;  %v1297_v21 = vmul.f32 %v1169_v30, %v3251_v24  ;;  %v1171_v49 = vadd.f32 1.0, %v2392_v7  ;;  %2409 = verf.f32 %v925_v19 }
 0x194   :  { %v3325_v50 = vpop.f32.mrb[51].mxu1  ;;  %v2394_v43 = vpop.eup %2393  ;;  %v928_v40 = vmul.f32 0.70710677, %v642_v36  ;;  %v391_v54 = vadd.f32 %v3137_v8, %v2806_v44  ;;  %v927_v15 = vmul.f32 0.70710677, %v387_v63  ;;  %v3362_v24 = vmul.f32 0.5, %v642_v36 }
 0x195   :  { %v2396_v60 = vpop.eup %2395  ;;  %v1173_v37 = vadd.f32 1.0, %v2394_v43  ;;  %1595 = vmatprep.mubr.f32.mxu0 %v1295_v62  ;;  %1820 = vmatprep.mubr.f32.mxu1 %v1297_v21  ;;  %v929_v29 = vmul.f32 0.70710677, %v644_v32  ;;  %v648_v30 = vadd.f32 %v3145_v45, %v2808_v46  ;;  %v1294_v8 = vmul.f32 %v3286_v38, %v3222_v34  ;;  %v3848_v38 = vld [vmem:[#allocation19_spill] sm:$0xff] }
 0x196   :  { %v3338_v12 = vpop.f32.mrb[52].mxu0  ;;  %v2398_v28 = vpop.eup %2397  ;;  %2411 = verf.f32 %v926_v27  ;;  %v3372_v43 = vmul.f32 0.5, %v387_v63  ;;  %v393_v42 = vadd.f32 %v3147_v18, %v2810_v48  ;;  %v1296_v36 = vmul.f32 %v3303_v61, %v3232_v59 }
 0x197   :  { %v3346_v58 = vpop.f32.mrb[52].mxu1  ;;  %v3348_v11 = vpop.f32.mrb[53].mxu0  ;;  %v3380_v62 = vadd.f32 1.0, %v2398_v28  ;;  %2413 = verf.f32 %v928_v40  ;;  %v930_v34 = vmul.f32 0.70710677, %v391_v54  ;;  %v650_v21 = vadd.f32 %v3848_v38, %v2813_v51  ;;  %1596 = vmatmul.mubr.f32.gmra.mrb[90].mxu0 %v1294_v8 }
 0x198   :  { %3844 = vst [vmem:[#allocation18_spill] sm:$0xff] %v3346_v58  ;;  %3845 = vst [vmem:[#allocation30_spill] sm:$0xff] %v3348_v11  ;;  %v3352_v33 = vpop.f32.mrb[53].mxu1  ;;  %v3356_v58 = vadd.f32 1.0, %v2396_v60  ;;  %v3358_v11 = vmul.f32 0.5, %v385_v35  ;;  %v2400_v35 = vpop.eup %2399  ;;  %2415 = verf.f32 %v927_v15  ;;  %1821 = vmatmul.mubr.f32.gmra.mrb[90].mxu1 %v1296_v36  ;;  %v397_v63 = vadd.f32 %v3165_v39, %v2806_v44 }
 0x199   :  { %v2402_v45 = vpop.eup %2401  ;;  %v1299_v18 = vmul.f32 %v1171_v49, %v3266_v6  ;;  %v1301_v59 = vmul.f32 %v1173_v37, %v3278_v22  ;;  %v1175_v28 = vadd.f32 1.0, %v2400_v35  ;;  %2417 = verf.f32 %v929_v29 }
 0x19a   :  { %v3360_v3 = vpop.f32.mrb[54].mxu0  ;;  %v2404_v27 = vpop.eup %2403  ;;  %v932_v40 = vmul.f32 0.70710677, %v648_v30  ;;  %v1177_v8 = vadd.f32 1.0, %v2402_v45  ;;  %v3394_v15 = vmul.f32 0.5, %v391_v54  ;;  %v654_v39 = vadd.f32 %v3169_v55, %v2808_v46  ;;  %v3852_v55 = vld [vmem:[#allocation20_spill] sm:$0xff] }
 0x19b   :  { %v3368_v7 = vpop.f32.mrb[54].mxu1  ;;  %v3370_v19 = vpop.f32.mrb[55].mxu0  ;;  %v931_v36 = vmul.f32 0.70710677, %v393_v42  ;;  %1600 = vmatprep.mubr.f32.mxu0 %v1299_v18  ;;  %1825 = vmatprep.mubr.f32.mxu1 %v1301_v59  ;;  %2419 = verf.f32 %v930_v34  ;;  %v399_v37 = vadd.f32 %v3175_v16, %v2810_v48  ;;  %v1298_v54 = vmul.f32 %v3317_v23, %v3253_v4  ;;  %v3854_v4 = vld [vmem:[#allocation21_spill] sm:$0xff] }
 0x19c   :  { %3846 = vst [vmem:[#allocation31_spill] sm:$0xff] %v3368_v7  ;;  %v3378_v60 = vpop.f32.mrb[55].mxu1  ;;  %v3390_v7 = vmul.f32 0.5, %v644_v32  ;;  %v2406_v49 = vpop.eup %2405  ;;  %v933_v32 = vmul.f32 0.70710677, %v650_v21  ;;  %v3406_v35 = vadd.f32 1.0, %v2404_v27  ;;  %v3410_v38 = vadd.f32 %v3852_v55, %v2813_v51 }
 0x19d   :  { %3847 = vst [vmem:[#allocation32_spill] sm:$0xff] %v3378_v60  ;;  %v2408_v29 = vpop.eup %2407  ;;  %v934_v45 = vmul.f32 0.70710677, %v397_v63  ;;  %v1300_v18 = vmul.f32 %v3340_v56, %v3264_v1  ;;  %2421 = verf.f32 %v932_v40  ;;  %v3418_v16 = vmul.f32 0.5, %v393_v42  ;;  %1601 = vmatmul.mubr.f32.gmra.mrb[92].mxu0 %v1298_v54 }
 0x19e   :  { %v3388_v61 = vpop.f32.mrb[56].mxu0  ;;  %v2410_v34 = vpop.eup %2409  ;;  %v403_v23 = vadd.f32 %v3854_v4, %v2806_v44  ;;  %2423 = verf.f32 %v931_v36  ;;  %v936_v55 = vmul.f32 0.70710677, %v654_v39  ;;  %v1303_v1 = vmul.f32 %v1175_v28, %v3305_v26 }
 0x19f   :  { %3849 = vst [vmem:[#allocation19_spill] sm:$0xff] %v3388_v61  ;;  %v3392_v60 = vpop.f32.mrb[56].mxu1  ;;  %v3398_v6 = vpop.f32.mrb[57].mxu0  ;;  %1826 = vmatmul.mubr.f32.gmra.mrb[92].mxu1 %v1300_v18  ;;  %v1305_v56 = vmul.f32 %v1177_v8, %v3309_v17  ;;  %v1180_v40 = vadd.f32 1.0, %v2406_v49  ;;  %v1179_v42 = vadd.f32 1.0, %v2408_v29  ;;  %2425 = verf.f32 %v933_v32  ;;  %v3857_v8 = vld [vmem:[#allocation22_spill] sm:$0xff] }
 0x1a0   :  { %3850 = vst [vmem:[#allocation33_spill] sm:$0xff] %v3392_v60  ;;  %v3400_v22 = vpop.f32.mrb[57].mxu1  ;;  %v3416_v60 = vmul.f32 0.5, %v648_v30  ;;  %v935_v54 = vmul.f32 0.70710677, %v399_v37  ;;  %2427 = verf.f32 %v934_v45  ;;  %v660_v36 = vadd.f32 %v3199_v9, %v2808_v46  ;;  %1605 = vmatprep.mubr.f32.mxu0 %v1303_v1 }
 0x1a1   :  { %3851 = vst [vmem:[#allocation34_spill] sm:$0xff] %v3400_v22  ;;  %v1181_v22 = vadd.f32 1.0, %v2410_v34  ;;  %v937_v4 = vmul.f32 0.70710677, %v3410_v38  ;;  %1830 = vmatprep.mubr.f32.mxu1 %v1305_v56  ;;  %v3435_v17 = vmul.f32 0.5, %v650_v21  ;;  %v405_v49 = vadd.f32 %v3857_v8, %v2810_v48 }
 0x1a2   :  { %v3414_v59 = vpop.f32.mrb[58].mxu0  ;;  %v938_v28 = vmul.f32 0.70710677, %v403_v23  ;;  %v1302_v32 = vmul.f32 %v3356_v58, %v3282_v2  ;;  %v3445_v9 = vmul.f32 0.5, %v397_v63  ;;  %2429 = verf.f32 %v936_v55  ;;  %v3860_v2 = vld [vmem:[#allocation13_spill] sm:$0xff] }
 0x1a3   :  { %3853 = vst [vmem:[#allocation20_spill] sm:$0xff] %v3414_v59  ;;  %v3422_v27 = vpop.f32.mrb[58].mxu1  ;;  %v3424_v61 = vpop.f32.mrb[59].mxu0  ;;  %v662_v1 = vadd.f32 %v3205_v57, %v2813_v51  ;;  %v1304_v21 = vmul.f32 %v3380_v62, %v3296_v0  ;;  %2431 = verf.f32 %v935_v54  ;;  %v409_v58 = vadd.f32 %v3860_v2, %v2806_v44 }
 0x1a4   :  { %3855 = vst [vmem:[#allocation21_spill] sm:$0xff] %v3422_v27  ;;  %v3428_v30 = vpop.f32.mrb[59].mxu1  ;;  %v2412_v59 = vpop.eup %2411  ;;  %v3453_v27 = vmul.f32 0.5, %v654_v39  ;;  %1606 = vmatmul.mubr.f32.gmra.mrb[94].mxu0 %v1302_v32  ;;  %2433 = verf.f32 %v937_v4  ;;  %v940_v63 = vmul.f32 0.70710677, %v660_v36  ;;  %v1307_v55 = vmul.f32 %v1179_v42, %v3333_v41 }
 0x1a5   :  { %v2414_v26 = vpop.eup %2413  ;;  %1831 = vmatmul.mubr.f32.gmra.mrb[94].mxu1 %v1304_v21  ;;  %v1309_v57 = vmul.f32 %v1181_v22, %v3342_v14  ;;  %2435 = verf.f32 %v938_v28  ;;  %v939_v39 = vmul.f32 0.70710677, %v405_v49  ;;  %v941_v2 = vmul.f32 0.70710677, %v662_v1 }
 0x1a6   :  { %v3433_v18 = vpop.f32.mrb[60].mxu0  ;;  %v2416_v34 = vpop.eup %2415  ;;  %v1184_v62 = vadd.f32 1.0, %v2414_v26  ;;  %v666_v4 = vadd.f32 %v3218_v25, %v2808_v46  ;;  %1610 = vmatprep.mubr.f32.mxu0 %v1307_v55  ;;  %v3474_v42 = vmul.f32 0.5, %v403_v23  ;;  %v942_v26 = vmul.f32 0.70710677, %v409_v58  ;;  %v3864_v25 = vld [vmem:[#allocation14_spill] sm:$0xff] }
 0x1a7   :  { %3856 = vst [vmem:[#allocation35_spill] sm:$0xff] %v3433_v18  ;;  %v3441_v29 = vpop.f32.mrb[60].mxu1  ;;  %v3443_v45 = vpop.f32.mrb[61].mxu0  ;;  %v1182_v18 = vadd.f32 1.0, %v2412_v59  ;;  %v1183_v54 = vadd.f32 1.0, %v2416_v34  ;;  %1835 = vmatprep.mubr.f32.mxu1 %v1309_v57  ;;  %v1306_v28 = vmul.f32 %v3406_v35, %v3319_v53  ;;  %2437 = verf.f32 %v940_v63  ;;  %v3865_v23 = vld [vmem:[#allocation23_spill] sm:$0xff] }
 0x1a8   :  { %3858 = vst [vmem:[#allocation22_spill] sm:$0xff] %v3441_v29  ;;  %v3451_v56 = vpop.f32.mrb[61].mxu1  ;;  %v2418_v8 = vpop.eup %2417  ;;  %v1308_v55 = vmul.f32 %v1180_v40, %v3331_v31  ;;  %2439 = verf.f32 %v939_v39  ;;  %v944_v35 = vmul.f32 0.70710677, %v666_v4  ;;  %v3491_v31 = vmul.f32 0.5, %v662_v1 }
 0x1a9   :  { %3859 = vst [vmem:[#allocation36_spill] sm:$0xff] %v3451_v56  ;;  %v2420_v0 = vpop.eup %2419  ;;  %v3461_v56 = vmul.f32 0.5, %v399_v37  ;;  %v1185_v32 = vadd.f32 1.0, %v2418_v8  ;;  %v3472_v37 = vmul.f32 0.5, %v3410_v38  ;;  %v411_v8 = vadd.f32 %v3864_v25, %v2810_v48  ;;  %1611 = vmatmul.mubr.f32.gmra.mrb[96].mxu0 %v1306_v28  ;;  %v3866_v28 = vld [vmem:[#allocation24_spill] sm:$0xff] }
 0x1aa   :  { %v3459_v29 = vpop.f32.mrb[62].mxu0  ;;  %v2422_v22 = vpop.eup %2421  ;;  %v3478_v21 = vadd.f32 1.0, %v2420_v0  ;;  %v3485_v38 = vmul.f32 0.5, %v405_v49  ;;  %2441 = verf.f32 %v941_v2  ;;  %1836 = vmatmul.mubr.f32.gmra.mrb[96].mxu1 %v1308_v55  ;;  %v1311_v63 = vmul.f32 %v1183_v54, %v3372_v43 }
 0x1ab   :  { %v3463_v59 = vpop.f32.mrb[62].mxu1  ;;  %v3467_v41 = vpop.f32.mrb[63].mxu0  ;;  %v1313_v0 = vmul.f32 %v1185_v32, %v3390_v7  ;;  %v1188_v25 = vadd.f32 1.0, %v2422_v22  ;;  %2443 = verf.f32 %v942_v26  ;;  %v415_v40 = vadd.f32 %v3238_v52, %v2806_v44  ;;  %v3867_v52 = vld [vmem:[#allocation15_spill] sm:$0xff] }
 0x1ac   :  { %3861 = vst [vmem:[#allocation13_spill] sm:$0xff] %v3463_v59  ;;  %3862 = vst [vmem:[#allocation37_spill] sm:$0xff] %v3467_v41  ;;  %v3469_v14 = vpop.f32.mrb[63].mxu1  ;;  %v2424_v34 = vpop.eup %2423  ;;  %v668_v41 = vadd.f32 %v3865_v23, %v2813_v51  ;;  %v943_v23 = vmul.f32 0.70710677, %v411_v8  ;;  %v672_v2 = vadd.f32 %v3866_v28, %v2808_v46  ;;  %1615 = vmatprep.mubr.f32.mxu0 %v1311_v63  ;;  %v3499_v7 = vmul.f32 0.5, %v409_v58 }
 0x1ad   :  { %3863 = vst [vmem:[#allocation38_spill] sm:$0xff] %v3469_v14  ;;  %v2426_v57 = vpop.eup %2425  ;;  %v3483_v14 = vmul.f32 0.5, %v660_v36  ;;  %v1187_v49 = vadd.f32 1.0, %v2424_v34  ;;  %1840 = vmatprep.mubr.f32.mxu1 %v1313_v0  ;;  %v1310_v54 = vmul.f32 %v1182_v18, %v3358_v11  ;;  %v3502_v22 = vmul.f32 0.5, %v666_v4  ;;  %v3868_v58 = vld [vmem:[#allocation25_spill] sm:$0xff] }
 0x1ae   :  { %v2428_v53 = vpop.eup %2427  ;;  %v1189_v39 = vadd.f32 1.0, %v2426_v57  ;;  %v945_v1 = vmul.f32 0.70710677, %v668_v41  ;;  %2445 = verf.f32 %v944_v35  ;;  %v417_v26 = vadd.f32 %v3867_v52, %v2810_v48 }
 0x1af   :  { %v2430_v36 = vpop.eup %2429  ;;  %v3497_v43 = vadd.f32 1.0, %v2428_v53  ;;  %v1312_v34 = vmul.f32 %v1184_v62, %v3362_v24  ;;  %v3507_v0 = vmul.f32 0.5, %v411_v8  ;;  %v946_v53 = vmul.f32 0.70710677, %v415_v40  ;;  %1616 = vmatmul.mubr.f32.gmra.mrb[98].mxu0 %v1310_v54  ;;  %v3869_v24 = vld [vmem:[#allocation16_spill] sm:$0xff] }
 0x1b0   :  { %v2432_v55 = vpop.eup %2431  ;;  %v1192_v63 = vadd.f32 1.0, %v2430_v36  ;;  %v674_v28 = vadd.f32 %v3868_v58, %v2813_v51  ;;  %2447 = verf.f32 %v943_v23  ;;  %v948_v11 = vmul.f32 0.70710677, %v672_v2 }
 0x1b1   :  { %v2434_v32 = vpop.eup %2433  ;;  %1841 = vmatmul.mubr.f32.gmra.mrb[98].mxu1 %v1312_v34  ;;  %v1315_v18 = vmul.f32 %v1187_v49, %v3418_v16  ;;  %v1317_v4 = vmul.f32 %v1189_v39, %v3435_v17  ;;  %v1191_v35 = vadd.f32 1.0, %v2432_v55  ;;  %v3513_v52 = vmul.f32 0.5, %v668_v41  ;;  %v3870_v17 = vld [vmem:[#allocation17_spill] sm:$0xff] }
 0x1b2   :  { %v2436_v57 = vpop.eup %2435  ;;  %2449 = verf.f32 %v945_v1  ;;  %v421_v62 = vadd.f32 %v3869_v24, %v2806_v44  ;;  %v1193_v36 = vadd.f32 1.0, %v2434_v32  ;;  %v3519_v58 = vmul.f32 0.5, %v415_v40  ;;  %v3871_v1 = vld [vmem:[#allocation26_spill] sm:$0xff] }
 0x1b3   :  { %v2438_v8 = vpop.eup %2437  ;;  %v3517_v59 = vadd.f32 1.0, %v2436_v57  ;;  %v947_v23 = vmul.f32 0.70710677, %v417_v26  ;;  %1620 = vmatprep.mubr.f32.mxu0 %v1315_v18  ;;  %1845 = vmatprep.mubr.f32.mxu1 %v1317_v4  ;;  %2451 = verf.f32 %v946_v53  ;;  %v949_v16 = vmul.f32 0.70710677, %v674_v28 }
 0x1b4   :  { %v2440_v54 = vpop.eup %2439  ;;  %v678_v41 = vadd.f32 %v3870_v17, %v2808_v46  ;;  %v1314_v49 = vmul.f32 %v3478_v21, %v3394_v15  ;;  %v3525_v55 = vmul.f32 0.5, %v672_v2  ;;  %2453 = verf.f32 %v948_v11 }
 0x1b5   :  { %v2442_v39 = vpop.eup %2441  ;;  %v423_v40 = vadd.f32 %v3871_v1, %v2810_v48  ;;  %v1316_v32 = vmul.f32 %v1188_v25, %v3416_v60  ;;  %v1196_v57 = vadd.f32 1.0, %v2438_v8  ;;  %v3530_v18 = vmul.f32 0.5, %v417_v26 }
 0x1b6   :  { %v2444_v34 = vpop.eup %2443  ;;  %v950_v53 = vmul.f32 0.70710677, %v421_v62  ;;  %v680_v4 = vadd.f32 %v3276_v13, %v2813_v51  ;;  %1621 = vmatmul.mubr.f32.gmra.mrb[100].mxu0 %v1314_v49  ;;  %2455 = verf.f32 %v947_v23  ;;  %v3534_v15 = vmul.f32 0.5, %v674_v28 }
 0x1b7   :  { %1846 = vmatmul.mubr.f32.gmra.mrb[100].mxu1 %v1316_v32  ;;  %v1319_v21 = vmul.f32 %v1191_v35, %v3461_v56  ;;  %v1321_v2 = vmul.f32 %v1193_v36, %v3472_v37  ;;  %v1195_v11 = vadd.f32 1.0, %v2440_v54  ;;  %2457 = verf.f32 %v949_v16  ;;  %v3872_v56 = vld [vmem:[#allocation27_spill] sm:$0xff]  ;;  %v3873_v16 = vld [vmem:[#allocation28_spill] sm:$0xff]  ;;  %v3874_v32 = vld [vmem:[#allocation29_spill] sm:$0xff] }
 0x1b8   :  { %v952_v60 = vmul.f32 0.70710677, %v678_v41  ;;  %v427_v25 = vadd.f32 %v3284_v20, %v2806_v44  ;;  %v2446_v26 = vpop.eup %2445  ;;  %v1197_v24 = vadd.f32 1.0, %v2442_v39  ;;  %v3540_v8 = vadd.f32 1.0, %v2444_v34 }
 0x1b9   :  { %v3542_v13 = vmul.f32 0.5, %v421_v62  ;;  %v951_v23 = vmul.f32 0.70710677, %v423_v40  ;;  %1625 = vmatprep.mubr.f32.mxu0 %v1319_v21  ;;  %1850 = vmatprep.mubr.f32.mxu1 %v1321_v2  ;;  %2459 = verf.f32 %v950_v53  ;;  %v953_v28 = vmul.f32 0.70710677, %v680_v4 }
 0x1ba   :  { %v684_v37 = vadd.f32 %v3872_v56, %v2808_v46  ;;  %v1318_v35 = vmul.f32 %v3497_v43, %v3445_v9  ;;  %v2448_v36 = vpop.eup %2447  ;;  %v3548_v54 = vmul.f32 0.5, %v678_v41  ;;  %v3550_v20 = vmul.f32 0.5, %v423_v40 }
 0x1bb   :  { %v429_v62 = vadd.f32 %v3873_v16, %v2810_v48  ;;  %v1320_v17 = vmul.f32 %v1192_v63, %v3453_v27  ;;  %v1200_v39 = vadd.f32 1.0, %v2446_v26  ;;  %2461 = verf.f32 %v952_v60 }
 0x1bc   :  { %v2450_v49 = vpop.eup %2449  ;;  %v954_v1 = vmul.f32 0.70710677, %v427_v25  ;;  %v686_v34 = vadd.f32 %v3874_v32, %v2813_v51  ;;  %1626 = vmatmul.mubr.f32.gmra.mrb[102].mxu0 %v1318_v35  ;;  %2463 = verf.f32 %v951_v23  ;;  %v3557_v9 = vmul.f32 0.5, %v680_v4  ;;  %v3876_v32 = vld [vmem:[#allocation30_spill] sm:$0xff] }
 0x1bd   :  { %1851 = vmatmul.mubr.f32.gmra.mrb[102].mxu1 %v1320_v17  ;;  %v1323_v43 = vmul.f32 %v1195_v11, %v3485_v38  ;;  %v1325_v41 = vmul.f32 %v1197_v24, %v3491_v31  ;;  %v2452_v40 = vpop.eup %2451  ;;  %v1199_v53 = vadd.f32 1.0, %v2448_v36  ;;  %2465 = verf.f32 %v953_v28 }
 0x1be   :  { %v956_v27 = vmul.f32 0.70710677, %v684_v37  ;;  %v433_v63 = vadd.f32 %v3313_v5, %v2806_v44  ;;  %v2454_v21 = vpop.eup %2453  ;;  %v1201_v2 = vadd.f32 1.0, %v2450_v49  ;;  %v3563_v60 = vmul.f32 0.5, %v427_v25 }
 0x1bf   :  { %v955_v26 = vmul.f32 0.70710677, %v429_v62  ;;  %v690_v4 = vadd.f32 %v3315_v10, %v2808_v46  ;;  %1630 = vmatprep.mubr.f32.mxu0 %v1323_v43  ;;  %1855 = vmatprep.mubr.f32.mxu1 %v1325_v41  ;;  %2467 = verf.f32 %v954_v1  ;;  %v957_v38 = vmul.f32 0.70710677, %v686_v34 }
 0x1c0   :  { %v435_v31 = vadd.f32 %v3323_v47, %v2810_v48  ;;  %v1322_v11 = vmul.f32 %v3517_v59, %v3474_v42  ;;  %v2456_v24 = vpop.eup %2455  ;;  %v1202_v5 = vadd.f32 1.0, %v2452_v40  ;;  %v3571_v23 = vmul.f32 0.5, %v684_v37 }
 0x1c1   :  { %v3573_v25 = vmul.f32 0.5, %v429_v62  ;;  %v1324_v28 = vmul.f32 %v1196_v57, %v3483_v14  ;;  %v2458_v56 = vpop.eup %2457  ;;  %v1204_v10 = vadd.f32 1.0, %v2454_v21  ;;  %2469 = verf.f32 %v956_v27 }
 0x1c2   :  { %v958_v35 = vmul.f32 0.70710677, %v433_v63  ;;  %v692_v36 = vadd.f32 %v3325_v50, %v2813_v51  ;;  %1631 = vmatmul.mubr.f32.gmra.mrb[104].mxu0 %v1322_v11  ;;  %2471 = verf.f32 %v955_v26  ;;  %v960_v47 = vmul.f32 0.70710677, %v690_v4  ;;  %v3875_v50 = vld [vmem:[#allocation18_spill] sm:$0xff] }
 0x1c3   :  { %1856 = vmatmul.mubr.f32.gmra.mrb[104].mxu1 %v1324_v28  ;;  %v1327_v59 = vmul.f32 %v1199_v53, %v3507_v0  ;;  %v1329_v42 = vmul.f32 %v1201_v2, %v3513_v52  ;;  %v2460_v37 = vpop.eup %2459  ;;  %v3580_v16 = vmul.f32 0.5, %v686_v34  ;;  %2473 = verf.f32 %v957_v38  ;;  %v3877_v28 = vld [vmem:[#allocation32_spill] sm:$0xff] }
 0x1c4   :  { %v959_v14 = vmul.f32 0.70710677, %v435_v31  ;;  %v439_v57 = vadd.f32 %v3338_v12, %v2806_v44  ;;  %v1203_v62 = vadd.f32 1.0, %v2456_v24  ;;  %v1205_v17 = vadd.f32 1.0, %v2458_v56 }
 0x1c5   :  { %v3584_v49 = vmul.f32 0.5, %v433_v63  ;;  %v696_v1 = vadd.f32 %v3875_v50, %v2808_v46  ;;  %1635 = vmatprep.mubr.f32.mxu0 %v1327_v59  ;;  %1860 = vmatprep.mubr.f32.mxu1 %v1329_v42  ;;  %v2462_v0 = vpop.eup %2461  ;;  %2475 = verf.f32 %v958_v35  ;;  %v961_v52 = vmul.f32 0.70710677, %v692_v36 }
 0x1c6   :  { %v441_v34 = vadd.f32 %v3876_v32, %v2810_v48  ;;  %v1326_v43 = vmul.f32 %v3540_v8, %v3499_v7  ;;  %v2464_v41 = vpop.eup %2463  ;;  %v3592_v12 = vadd.f32 1.0, %v2460_v37  ;;  %v3594_v40 = vmul.f32 0.5, %v690_v4  ;;  %v3878_v37 = vld [vmem:[#allocation31_spill] sm:$0xff] }
 0x1c7   :  { %2477 = verf.f32 %v960_v47  ;;  %v1328_v53 = vmul.f32 %v1200_v39, %v3502_v22  ;;  %v2466_v27 = vpop.eup %2465  ;;  %v3597_v63 = vmul.f32 0.5, %v435_v31  ;;  %v962_v21 = vmul.f32 0.70710677, %v439_v57 }
 0x1c8   :  { %2479 = verf.f32 %v959_v14  ;;  %v698_v2 = vadd.f32 %v3352_v33, %v2813_v51  ;;  %1636 = vmatmul.mubr.f32.gmra.mrb[106].mxu0 %v1326_v43  ;;  %v964_v26 = vmul.f32 0.70710677, %v696_v1  ;;  %v3603_v7 = vadd.f32 %v3360_v3, %v2806_v44 }
 0x1c9   :  { %1861 = vmatmul.mubr.f32.gmra.mrb[106].mxu1 %v1328_v53  ;;  %v1331_v8 = vmul.f32 %v1203_v62, %v3530_v18  ;;  %v1333_v4 = vmul.f32 %v1205_v17, %v3534_v15  ;;  %v2468_v22 = vpop.eup %2467  ;;  %v1208_v39 = vadd.f32 1.0, %v2462_v0  ;;  %2481 = verf.f32 %v961_v52  ;;  %v3879_v62 = vld [vmem:[#allocation34_spill] sm:$0xff] }
 0x1ca   :  { %v963_v38 = vmul.f32 0.70710677, %v441_v34  ;;  %v3609_v31 = vadd.f32 %v3370_v19, %v2810_v48  ;;  %v1207_v33 = vadd.f32 1.0, %v2464_v41  ;;  %v1209_v11 = vadd.f32 1.0, %v2466_v27 }
 0x1cb   :  { %v3611_v24 = vmul.f32 0.5, %v692_v36  ;;  %v3615_v3 = vadd.f32 %v3877_v28, %v2813_v51  ;;  %1640 = vmatprep.mubr.f32.mxu0 %v1331_v8  ;;  %1865 = vmatprep.mubr.f32.mxu1 %v1333_v4  ;;  %v2470_v18 = vpop.eup %2469  ;;  %v3617_v15 = vmul.f32 0.5, %v439_v57  ;;  %2483 = verf.f32 %v962_v21 }
 0x1cc   :  { %v965_v56 = vmul.f32 0.70710677, %v698_v2  ;;  %v1330_v35 = vmul.f32 %v1202_v5, %v3519_v58  ;;  %v2472_v47 = vpop.eup %2471  ;;  %v3620_v19 = vadd.f32 1.0, %v2468_v22  ;;  %2485 = verf.f32 %v964_v26 }
 0x1cd   :  { %v966_v36 = vmul.f32 0.70710677, %v3603_v7  ;;  %v1332_v59 = vmul.f32 %v1204_v10, %v3525_v55  ;;  %v2474_v42 = vpop.eup %2473  ;;  %2487 = verf.f32 %v963_v38  ;;  %v3626_v14 = vadd.f32 %v3878_v37, %v2808_v46  ;;  %v3881_v38 = vld [vmem:[#allocation33_spill] sm:$0xff] }
 0x1ce   :  { %v967_v57 = vmul.f32 0.70710677, %v3609_v31  ;;  %1641 = vmatmul.mubr.f32.gmra.mrb[108].mxu0 %v1330_v35  ;;  %v3631_v58 = vadd.f32 %v3398_v6, %v2810_v48  ;;  %v969_v5 = vmul.f32 0.70710677, %v3615_v3  ;;  %v3636_v17 = vadd.f32 %v3879_v62, %v2813_v51  ;;  %v3880_v6 = vld [vmem:[#allocation19_spill] sm:$0xff] }
 0x1cf   :  { %1866 = vmatmul.mubr.f32.gmra.mrb[108].mxu1 %v1332_v59  ;;  %v1335_v55 = vmul.f32 %v1207_v33, %v3550_v20  ;;  %v1337_v10 = vmul.f32 %v1209_v11, %v3557_v9  ;;  %v2476_v50 = vpop.eup %2475  ;;  %v3640_v0 = vmul.f32 0.5, %v696_v1  ;;  %v3642_v52 = vmul.f32 0.5, %v441_v34 }
 0x1d0   :  { %2489 = verf.f32 %v965_v56  ;;  %v3646_v32 = vadd.f32 %v3880_v6, %v2806_v44  ;;  %v1212_v41 = vadd.f32 1.0, %v2470_v18  ;;  %v1211_v53 = vadd.f32 1.0, %v2472_v47 }
 0x1d1   :  { %v2478_v43 = vpop.eup %2477  ;;  %v1213_v27 = vadd.f32 1.0, %v2474_v42  ;;  %2491 = verf.f32 %v966_v36  ;;  %1645 = vmatprep.mubr.f32.mxu0 %v1335_v55  ;;  %1870 = vmatprep.mubr.f32.mxu1 %v1337_v10  ;;  %v3648_v21 = vmul.f32 0.5, %v698_v2  ;;  %v971_v9 = vmul.f32 0.70710677, %v3631_v58  ;;  %v3884_v10 = vld [vmem:[#allocation35_spill] sm:$0xff] }
 0x1d2   :  { %v2480_v20 = vpop.eup %2479  ;;  %2493 = verf.f32 %v967_v57  ;;  %v1334_v1 = vmul.f32 %v3592_v12, %v3542_v13  ;;  %v968_v34 = vmul.f32 0.70710677, %v3626_v14  ;;  %v973_v26 = vmul.f32 0.70710677, %v3636_v17  ;;  %v3882_v12 = vld [vmem:[#allocation20_spill] sm:$0xff] }
 0x1d3   :  { %2495 = verf.f32 %v969_v5  ;;  %v1336_v8 = vmul.f32 %v1208_v39, %v3548_v54  ;;  %v2482_v4 = vpop.eup %2481  ;;  %v970_v22 = vmul.f32 0.70710677, %v3646_v32  ;;  %v3659_v2 = vadd.f32 %v3881_v38, %v2808_v46  ;;  %v3883_v39 = vld [vmem:[#allocation21_spill] sm:$0xff] }
 0x1d4   :  { %1646 = vmatmul.mubr.f32.gmra.mrb[110].mxu0 %v1334_v1  ;;  %v3663_v33 = vadd.f32 %v3424_v61, %v2810_v48  ;;  %v3667_v13 = vadd.f32 %v3428_v30, %v2813_v51  ;;  %v3671_v54 = vadd.f32 %v3882_v12, %v2806_v44  ;;  %v3675_v11 = vadd.f32 %v3883_v39, %v2808_v46  ;;  %v3887_v39 = vld [vmem:[#allocation13_spill] sm:$0xff] }
 0x1d5   :  { %1871 = vmatmul.mubr.f32.gmra.mrb[110].mxu1 %v1336_v8  ;;  %v1339_v28 = vmul.f32 %v1211_v53, %v3573_v25  ;;  %v1341_v18 = vmul.f32 %v1213_v27, %v3580_v16  ;;  %v2484_v56 = vpop.eup %2483  ;;  %v1214_v61 = vadd.f32 1.0, %v2476_v50  ;;  %v1216_v35 = vadd.f32 1.0, %v2478_v43 }
 0x1d6   :  { %v3680_v47 = vmul.f32 0.5, %v3603_v7  ;;  %2497 = verf.f32 %v971_v9  ;;  %v2486_v30 = vpop.eup %2485  ;;  %v1215_v36 = vadd.f32 1.0, %v2480_v20  ;;  %v1217_v59 = vadd.f32 1.0, %v2482_v4 }
 0x1d7   :  { %2499 = verf.f32 %v973_v26  ;;  %v975_v42 = vmul.f32 0.70710677, %v3663_v33  ;;  %1650 = vmatprep.mubr.f32.mxu0 %v1339_v28  ;;  %1875 = vmatprep.mubr.f32.mxu1 %v1341_v18  ;;  %v2488_v37 = vpop.eup %2487  ;;  %v972_v25 = vmul.f32 0.70710677, %v3659_v2  ;;  %v977_v16 = vmul.f32 0.70710677, %v3667_v13 }
 0x1d8   :  { %2501 = verf.f32 %v968_v34  ;;  %v1338_v57 = vmul.f32 %v3620_v19, %v3563_v60  ;;  %v974_v7 = vmul.f32 0.70710677, %v3671_v54  ;;  %v976_v5 = vmul.f32 0.70710677, %v3675_v11  ;;  %v3885_v60 = vld [vmem:[#allocation36_spill] sm:$0xff]  ;;  %v3888_v18 = vld [vmem:[#allocation37_spill] sm:$0xff] }
 0x1d9   :  { %2503 = verf.f32 %v970_v22  ;;  %v1340_v62 = vmul.f32 %v1212_v41, %v3571_v23  ;;  %v3692_v50 = vadd.f32 %v3884_v10, %v2806_v44  ;;  %v3696_v6 = vadd.f32 %v3443_v45, %v2810_v48  ;;  %v3886_v23 = vld [vmem:[#allocation22_spill] sm:$0xff] }
 0x1da   :  { %v2490_v55 = vpop.eup %2489  ;;  %2505 = verf.f32 %v975_v42  ;;  %1651 = vmatmul.mubr.f32.gmra.mrb[112].mxu0 %v1338_v57  ;;  %v3700_v19 = vadd.f32 %v3885_v60, %v2813_v51  ;;  %v3704_v41 = vadd.f32 %v3886_v23, %v2808_v46  ;;  %v1343_v53 = vmul.f32 %v1215_v36, %v3597_v63 }
 0x1db   :  { %v2492_v43 = vpop.eup %2491  ;;  %2507 = verf.f32 %v977_v16  ;;  %1876 = vmatmul.mubr.f32.gmra.mrb[112].mxu1 %v1340_v62  ;;  %v1345_v27 = vmul.f32 %v1217_v59, %v3611_v24  ;;  %v1218_v9 = vadd.f32 1.0, %v2484_v56  ;;  %v839_v45 = vmul.f32 0.5, %v3609_v31 }
 0x1dc   :  { %v2494_v20 = vpop.eup %2493  ;;  %v841_v1 = vmul.f32 0.5, %v3615_v3  ;;  %2509 = verf.f32 %v972_v25  ;;  %v1219_v26 = vadd.f32 1.0, %v2488_v37  ;;  %v1221_v8 = vadd.f32 1.0, %v2490_v55  ;;  %1655 = vmatprep.mubr.f32.mxu0 %v1343_v53 }
 0x1dd   :  { %v2496_v34 = vpop.eup %2495  ;;  %2511 = verf.f32 %v974_v7  ;;  %v979_v4 = vmul.f32 0.70710677, %v3696_v6  ;;  %1880 = vmatprep.mubr.f32.mxu1 %v1345_v27  ;;  %v978_v63 = vmul.f32 0.70710677, %v3692_v50  ;;  %v981_v24 = vmul.f32 0.70710677, %v3700_v19 }
 0x1de   :  { %2513 = verf.f32 %v976_v5  ;;  %v1342_v22 = vmul.f32 %v1214_v61, %v3584_v49  ;;  %v980_v31 = vmul.f32 0.70710677, %v3704_v41  ;;  %v1344_v3 = vmul.f32 %v1216_v35, %v3594_v40  ;;  %v3889_v49 = vld [vmem:[#allocation38_spill] sm:$0xff] }
 0x1df   :  { %2515 = verf.f32 %v979_v4  ;;  %v3718_v38 = vadd.f32 %v3459_v29, %v2806_v44  ;;  %v3722_v28 = vadd.f32 %v3887_v39, %v2808_v46  ;;  %v3726_v56 = vadd.f32 %v3888_v18, %v2810_v48 }
 0x1e0   :  { %v2498_v12 = vpop.eup %2497  ;;  %2517 = verf.f32 %v981_v24  ;;  %1656 = vmatmul.mubr.f32.gmra.mrb[114].mxu0 %v1342_v22  ;;  %v3730_v61 = vadd.f32 %v3889_v49, %v2813_v51  ;;  %v1220_v35 = vadd.f32 1.0, %v2486_v30  ;;  %v1223_v36 = vadd.f32 1.0, %v2494_v20  ;;  %1881 = vmatmul.mubr.f32.gmra.mrb[114].mxu1 %v1344_v3 }
 0x1e1   :  { %v2500_v40 = vpop.eup %2499  ;;  %v1347_v44 = vmul.f32 %v1219_v26, %v3642_v52  ;;  %v1349_v29 = vmul.f32 %v1221_v8, %v3648_v21  ;;  %v1222_v42 = vadd.f32 1.0, %v2492_v43  ;;  %v1225_v46 = vadd.f32 1.0, %v2496_v34 }
 0x1e2   :  { %v2502_v59 = vpop.eup %2501  ;;  %v843_v37 = vmul.f32 0.5, %v3631_v58  ;;  %2519 = verf.f32 %v978_v63  ;;  %v1227_v25 = vadd.f32 1.0, %v2498_v12  ;;  %v982_v51 = vmul.f32 0.70710677, %v3718_v38 }
 0x1e3   :  { %v2504_v48 = vpop.eup %2503  ;;  %2521 = verf.f32 %v980_v31  ;;  %v983_v16 = vmul.f32 0.70710677, %v3726_v56  ;;  %1660 = vmatprep.mubr.f32.mxu0 %v1347_v44  ;;  %1885 = vmatprep.mubr.f32.mxu1 %v1349_v29  ;;  %v1229_v57 = vadd.f32 1.0, %v2500_v40  ;;  %v984_v52 = vmul.f32 0.70710677, %v3722_v28 }
 0x1e4   :  { %v2506_v30 = vpop.eup %2505  ;;  %v985_v21 = vmul.f32 0.70710677, %v3730_v61  ;;  %v1346_v7 = vmul.f32 %v1218_v9, %v3617_v15  ;;  %v1224_v58 = vadd.f32 1.0, %v2502_v59  ;;  %v1348_v62 = vmul.f32 %v1220_v35, %v3640_v0 }
 0x1e5   :  { %v2508_v5 = vpop.eup %2507  ;;  %2523 = verf.f32 %v983_v16  ;;  %v1351_v55 = vmul.f32 %v1223_v36, %v839_v45  ;;  %v840_v60 = vmul.f32 0.5, %v3626_v14  ;;  %v845_v43 = vmul.f32 0.5, %v3636_v17 }
 0x1e6   :  { %v2510_v10 = vpop.eup %2509  ;;  %2525 = verf.f32 %v985_v21  ;;  %1661 = vmatmul.mubr.f32.gmra.mrb[116].mxu0 %v1346_v7  ;;  %v1353_v23 = vmul.f32 %v1225_v46, %v841_v1  ;;  %v1226_v27 = vadd.f32 1.0, %v2504_v48  ;;  %v1231_v20 = vadd.f32 1.0, %v2506_v30  ;;  %1886 = vmatmul.mubr.f32.gmra.mrb[116].mxu1 %v1348_v62 }
 0x1e7   :  { %v2512_v53 = vpop.eup %2511  ;;  %2527 = verf.f32 %v982_v51  ;;  %1665 = vmatprep.mubr.f32.mxu0 %v1351_v55  ;;  %v1355_v15 = vmul.f32 %v1227_v25, %v843_v37  ;;  %v1233_v34 = vadd.f32 1.0, %v2508_v5  ;;  %v1350_v0 = vmul.f32 %v1222_v42, %v3680_v47 }
 0x1e8   :  { %v2514_v9 = vpop.eup %2513  ;;  %2529 = verf.f32 %v984_v52  ;;  %1890 = vmatprep.mubr.f32.mxu1 %v1353_v23  ;;  %v1357_v45 = vmul.f32 %v1229_v57, %v845_v43  ;;  %v1228_v26 = vadd.f32 1.0, %v2510_v10  ;;  %v847_v17 = vmul.f32 0.5, %v3663_v33 }
 0x1e9   :  { %v2516_v14 = vpop.eup %2515  ;;  %v1352_v8 = vmul.f32 %v1224_v58, %v840_v60  ;;  %v842_v4 = vmul.f32 0.5, %v3646_v32  ;;  %v849_v63 = vmul.f32 0.5, %v3667_v13  ;;  %v844_v24 = vmul.f32 0.5, %v3659_v2  ;;  %v3761_v60 = vld [vmem:[%s3814_s4] ss:$0 sm:$0xff]  ;;  %s2634_s4 = smov [#allocation9]  }
 0x1ea   :  { %v2518_v1 = vpop.eup %2517  ;;  %1666 = vmatmul.mubr.f32.gmra.mrb[118].mxu0 %v1350_v0  ;;  %v1235_v22 = vadd.f32 1.0, %v2516_v14  ;;  %v1359_v31 = vmul.f32 %v1231_v20, %v847_v17  ;;  %v1230_v47 = vadd.f32 1.0, %v2512_v53  ;;  %v1232_v49 = vadd.f32 1.0, %v2514_v9  ;;  %s2091_s8 = sshll.u32 %s2634_s4, 4  ;;  %s2092_s8 = int_to_ptr.vmem [resolvable:$true] %s2091_s8 }
 0x1eb   :  { %1891 = vmatmul.mubr.f32.gmra.mrb[118].mxu1 %v1352_v8  ;;  %1670 = vmatprep.mubr.f32.mxu0 %v1355_v15  ;;  %v1237_v12 = vadd.f32 1.0, %v2518_v1  ;;  %v1354_v39 = vmul.f32 %v1226_v27, %v842_v4  ;;  %v1361_v18 = vmul.f32 %v1233_v34, %v849_v63  ;;  %v851_v40 = vmul.f32 0.5, %v3696_v6  ;;  %s2597_s9 = scalar_lea.vmem %s2092_s8, 4096  ;;  %p2602_p11 = scmp.lt.s32.totalorder %s2092_s8, %s2092_s8 }
 0x1ec   :  { %v2520_v3 = vpop.eup %2519  ;;  %1895 = vmatprep.mubr.f32.mxu1 %v1357_v45  ;;  %v1356_v32 = vmul.f32 %v1228_v26, %v844_v24  ;;  %v846_v13 = vmul.f32 0.5, %v3671_v54  ;;  %v853_v35 = vmul.f32 0.5, %v3700_v19  ;;  %v848_v36 = vmul.f32 0.5, %v3675_v11  ;;  %p2598_p10 = scmp.ne.s32.totalorder %s2092_s8, %s2597_s9  ;;  %p2603_p12 = scmp.lt.s32.totalorder %s2597_s9, %s2597_s9 }
 0x1ed   :  { %v2522_v33 = vpop.eup %2521  ;;  %v1363_v44 = vmul.f32 %v1235_v22, %v851_v40  ;;  %v1234_v59 = vadd.f32 1.0, %v2520_v3  ;;  %v855_v25 = vmul.f32 0.5, %v3726_v56  ;;  %v850_v16 = vmul.f32 0.5, %v3692_v50 }
 0x1ee   :  { %1671 = vmatmul.mubr.f32.gmra.mrb[120].mxu0 %v1354_v39  ;;  %v1358_v46 = vmul.f32 %v1230_v47, %v846_v13  ;;  %v1365_v37 = vmul.f32 %v1237_v12, %v853_v35  ;;  %v1236_v6 = vadd.f32 1.0, %v2522_v33  ;;  %v1360_v51 = vmul.f32 %v1232_v49, %v848_v36  ;;  %p2604_p13 = por %p2603_p12, %p2602_p11 }
 0x1ef   :  { %v2524_v2 = vpop.eup %2523  ;;  %1896 = vmatmul.mubr.f32.gmra.mrb[120].mxu1 %v1356_v32  ;;  %1675 = vmatprep.mubr.f32.mxu0 %v1359_v31  ;;  %v857_v11 = vmul.f32 0.5, %v3730_v61  ;;  %v852_v30 = vmul.f32 0.5, %v3704_v41  ;;  %v1362_v21 = vmul.f32 %v1234_v59, %v850_v16  ;;  %v854_v56 = vmul.f32 0.5, %v3718_v38 }
 0x1f0   :  { %v2526_v29 = vpop.eup %2525  ;;  %v1239_v42 = vadd.f32 1.0, %v2524_v2  ;;  %1900 = vmatprep.mubr.f32.mxu1 %v1361_v18  ;;  %v856_v62 = vmul.f32 0.5, %v3722_v28  ;;  %p2605_p0 = pnand %p2604_p13, %p2598_p10 }
 0x1f1   :  { %v2528_v48 = vpop.eup %2527  ;;  %v1241_v54 = vadd.f32 1.0, %v2526_v29  ;;  %v1364_v58 = vmul.f32 %v1236_v6, %v852_v30 }
 0x1f2   :  { %v2530_v19 = vpop.eup %2529  ;;  %1676 = vmatmul.mubr.f32.gmra.mrb[122].mxu0 %v1358_v46  ;;  %v1367_v57 = vmul.f32 %v1239_v42, %v855_v25  ;;  %v1238_v52 = vadd.f32 1.0, %v2528_v48 }
 0x1f3   :  { %1901 = vmatmul.mubr.f32.gmra.mrb[122].mxu1 %v1360_v51  ;;  %1680 = vmatprep.mubr.f32.mxu0 %v1363_v44  ;;  %v1369_v7 = vmul.f32 %v1241_v54, %v857_v11  ;;  %v1240_v5 = vadd.f32 1.0, %v2530_v19 }
 0x1f4   :  { %1905 = vmatprep.mubr.f32.mxu1 %v1365_v37  ;;  %v1366_v50 = vmul.f32 %v1238_v52, %v854_v56 }
 0x1f5   :  { %v1368_v61 = vmul.f32 %v1240_v5, %v856_v62 }
 0x1f6   :  { %1681 = vmatmul.mubr.f32.gmra.mrb[124].mxu0 %v1362_v21 }
 0x1f7   :  { %1906 = vmatmul.mubr.f32.gmra.mrb[124].mxu1 %v1364_v58  ;;  %1685 = vmatprep.mubr.f32.mxu0 %v1367_v57 }
 0x1f8   :  { %1910 = vmatprep.mubr.f32.mxu1 %v1369_v7 }
 0x1fa   :  { %1686 = vmatmul.mubr.f32.gmra.mrb[126].mxu0 %v1366_v50 }
 0x1fb   :  { %1911 = vmatmul.mubr.f32.gmra.mrb[126].mxu1 %v1368_v61 }
 0x21a   :  { %v1532_v41 = vpop.f32.mrb[64].mxu0 }
 0x21b   :  { %v1534_v55 = vpop.f32.mrb[65].mxu0 }
 0x21c   :  { %v1757_v10 = vpop.f32.mrb[64].mxu1 }
 0x21d   :  { %v1758_v43 = vadd.f32 %v1757_v10, %v1532_v41  ;;  %v1759_v38 = vpop.f32.mrb[65].mxu1 }
 0x21f   :  { %v2022_v23 = vadd.f32 %v3761_v60, %v1758_v43 }
 0x221   :  { %2054 = vst [vmem:[#allocation9] sm:$0xff] %v2022_v23  ;;  %v1537_v28 = vpop.f32.mrb[66].mxu0  ;;  %v1762_v53 = vpop.f32.mrb[66].mxu1 }
 0x222   :  { %v1763_v27 = vadd.f32 %v1762_v53, %v1537_v28  ;;  %v1539_v20 = vpop.f32.mrb[67].mxu0  ;;  %v1764_v15 = vpop.f32.mrb[67].mxu1 }
 0x224   :  { %v2023_v9 = vadd.f32 %v3761_v60, %v1763_v27 }
 0x226   :  { %2055 = vst [vmem:[#allocation9 + $0x8] sm:$0xff] %v2023_v9 }
 0x227   :  { %v1542_v34 = vpop.f32.mrb[68].mxu0 }
 0x228   :  { %v1767_v0 = vpop.f32.mrb[68].mxu1  ;;  %v1544_v45 = vpop.f32.mrb[69].mxu0 }
 0x229   :  { %v1768_v14 = vadd.f32 %v1767_v0, %v1542_v34  ;;  %v1769_v26 = vpop.f32.mrb[69].mxu1 }
 0x22b   :  { %v2024_v17 = vadd.f32 %v3761_v60, %v1768_v14 }
 0x22d   :  { %2056 = vst [vmem:[#allocation9 + $0x10] sm:$0xff] %v2024_v17  ;;  %v1547_v8 = vpop.f32.mrb[70].mxu0 }
 0x22e   :  { %v1772_v1 = vpop.f32.mrb[70].mxu1  ;;  %v1549_v4 = vpop.f32.mrb[71].mxu0 }
 0x22f   :  { %v1773_v63 = vadd.f32 %v1772_v1, %v1547_v8  ;;  %v1774_v24 = vpop.f32.mrb[71].mxu1 }
 0x231   :  { %v2025_v22 = vadd.f32 %v3761_v60, %v1773_v63 }
 0x233   :  { %2057 = vst [vmem:[#allocation9 + $0x18] sm:$0xff] %v2025_v22  ;;  %v1552_v31 = vpop.f32.mrb[72].mxu0 }
 0x234   :  { %v1777_v3 = vpop.f32.mrb[72].mxu1  ;;  %v1554_v47 = vpop.f32.mrb[73].mxu0 }
 0x235   :  { %v1778_v12 = vadd.f32 %v1777_v3, %v1552_v31  ;;  %v1779_v39 = vpop.f32.mrb[73].mxu1 }
 0x237   :  { %v2026_v18 = vadd.f32 %v3761_v60, %v1778_v12 }
 0x238   :  { %v1557_v33 = vpop.f32.mrb[74].mxu0 }
 0x239   :  { %2058 = vst [vmem:[#allocation9 + $0x20] sm:$0xff] %v2026_v18  ;;  %v1559_v40 = vpop.f32.mrb[75].mxu0 }
 0x23d   :  { %v1782_v49 = vpop.f32.mrb[74].mxu1 }
 0x23e   :  { %v1783_v32 = vadd.f32 %v1782_v49, %v1557_v33  ;;  %v1784_v13 = vpop.f32.mrb[75].mxu1 }
 0x23f   :  { %v1562_v2 = vpop.f32.mrb[76].mxu0 }
 0x240   :  { %v2027_v35 = vadd.f32 %v3761_v60, %v1783_v32  ;;  %v1564_v44 = vpop.f32.mrb[77].mxu0 }
 0x241   :  { %v1787_v36 = vpop.f32.mrb[76].mxu1 }
 0x242   :  { %2059 = vst [vmem:[#allocation9 + $0x28] sm:$0xff] %v2027_v35  ;;  %v1788_v29 = vadd.f32 %v1787_v36, %v1562_v2  ;;  %v1789_v59 = vpop.f32.mrb[77].mxu1 }
 0x244   :  { %v2028_v42 = vadd.f32 %v3761_v60, %v1788_v29 }
 0x245   :  { %v1567_v46 = vpop.f32.mrb[78].mxu0 }
 0x246   :  { %2060 = vst [vmem:[#allocation9 + $0x30] sm:$0xff] %v2028_v42  ;;  %v1792_v37 = vpop.f32.mrb[78].mxu1  ;;  %v1569_v48 = vpop.f32.mrb[79].mxu0 }
 0x247   :  { %v1793_v6 = vadd.f32 %v1792_v37, %v1567_v46  ;;  %v1794_v25 = vpop.f32.mrb[79].mxu1 }
 0x249   :  { %v2029_v54 = vadd.f32 %v3761_v60, %v1793_v6 }
 0x24b   :  { %2061 = vst [vmem:[#allocation9 + $0x38] sm:$0xff] %v2029_v54  ;;  %v1572_v51 = vpop.f32.mrb[80].mxu0 }
 0x24c   :  { %v1797_v19 = vpop.f32.mrb[80].mxu1  ;;  %v1574_v16 = vpop.f32.mrb[81].mxu0 }
 0x24d   :  { %v1798_v11 = vadd.f32 %v1797_v19, %v1572_v51  ;;  %v1799_v30 = vpop.f32.mrb[81].mxu1 }
 0x24f   :  { %v2030_v57 = vadd.f32 %v3761_v60, %v1798_v11 }
 0x251   :  { %2062 = vst [vmem:[#allocation9 + $0x40] sm:$0xff] %v2030_v57  ;;  %v1577_v52 = vpop.f32.mrb[82].mxu0  ;;  %v1802_v21 = vpop.f32.mrb[82].mxu1 }
 0x252   :  { %v1579_v7 = vpop.f32.mrb[83].mxu0  ;;  %v1803_v5 = vadd.f32 %v1802_v21, %v1577_v52  ;;  %v1804_v58 = vpop.f32.mrb[83].mxu1 }
 0x254   :  { %v2031_v56 = vadd.f32 %v3761_v60, %v1803_v5 }
 0x255   :  { %v1582_v62 = vpop.f32.mrb[84].mxu0  ;;  %v1807_v50 = vpop.f32.mrb[84].mxu1 }
 0x256   :  { %2063 = vst [vmem:[#allocation9 + $0x48] sm:$0xff] %v2031_v56  ;;  %v1584_v61 = vpop.f32.mrb[85].mxu0  ;;  %v1808_v41 = vadd.f32 %v1807_v50, %v1582_v62  ;;  %v1809_v55 = vpop.f32.mrb[85].mxu1 }
 0x258   :  { %v2032_v10 = vadd.f32 %v3761_v60, %v1808_v41 }
 0x25a   :  { %2064 = vst [vmem:[#allocation9 + $0x50] sm:$0xff] %v2032_v10 }
 0x25d   :  { %v1812_v38 = vpop.f32.mrb[86].mxu1 }
 0x25e   :  { %v1587_v43 = vpop.f32.mrb[86].mxu0  ;;  %v1814_v53 = vpop.f32.mrb[87].mxu1 }
 0x25f   :  { %v1589_v23 = vpop.f32.mrb[87].mxu0  ;;  %v1813_v28 = vadd.f32 %v1812_v38, %v1587_v43 }
 0x261   :  { %v2033_v27 = vadd.f32 %v3761_v60, %v1813_v28 }
 0x263   :  { %2065 = vst [vmem:[#allocation9 + $0x58] sm:$0xff] %v2033_v27 }
 0x264   :  { %v1592_v20 = vpop.f32.mrb[88].mxu0 }
 0x265   :  { %v1594_v9 = vpop.f32.mrb[89].mxu0 }
 0x266   :  { %v1817_v15 = vpop.f32.mrb[88].mxu1 }
 0x267   :  { %v1818_v34 = vadd.f32 %v1817_v15, %v1592_v20  ;;  %v1819_v0 = vpop.f32.mrb[89].mxu1 }
 0x269   :  { %v2034_v45 = vadd.f32 %v3761_v60, %v1818_v34 }
 0x26a   :  { %v1597_v14 = vpop.f32.mrb[90].mxu0 }
 0x26b   :  { %2066 = vst [vmem:[#allocation9 + $0x60] sm:$0xff] %v2034_v45  ;;  %v1822_v26 = vpop.f32.mrb[90].mxu1  ;;  %v1599_v17 = vpop.f32.mrb[91].mxu0 }
 0x26c   :  { %v1823_v8 = vadd.f32 %v1822_v26, %v1597_v14  ;;  %v1824_v1 = vpop.f32.mrb[91].mxu1 }
 0x26e   :  { %v2035_v4 = vadd.f32 %v3761_v60, %v1823_v8 }
 0x270   :  { %2067 = vst [vmem:[#allocation9 + $0x68] sm:$0xff] %v2035_v4  ;;  %v1602_v63 = vpop.f32.mrb[92].mxu0 }
 0x271   :  { %v1604_v22 = vpop.f32.mrb[93].mxu0 }
 0x272   :  { %v1827_v24 = vpop.f32.mrb[92].mxu1 }
 0x273   :  { %v1828_v31 = vadd.f32 %v1827_v24, %v1602_v63  ;;  %v1829_v3 = vpop.f32.mrb[93].mxu1 }
 0x275   :  { %v2036_v47 = vadd.f32 %v3761_v60, %v1828_v31 }
 0x277   :  { %2068 = vst [vmem:[#allocation9 + $0x70] sm:$0xff] %v2036_v47  ;;  %v1607_v12 = vpop.f32.mrb[94].mxu0 }
 0x278   :  { %v1832_v39 = vpop.f32.mrb[94].mxu1  ;;  %v1609_v18 = vpop.f32.mrb[95].mxu0 }
 0x279   :  { %v1833_v33 = vadd.f32 %v1832_v39, %v1607_v12  ;;  %v1834_v49 = vpop.f32.mrb[95].mxu1 }
 0x27b   :  { %v2037_v40 = vadd.f32 %v3761_v60, %v1833_v33 }
 0x27c   :  { %v1612_v32 = vpop.f32.mrb[96].mxu0 }
 0x27d   :  { %2069 = vst [vmem:[#allocation9 + $0x78] sm:$0xff] %v2037_v40  ;;  %v1837_v13 = vpop.f32.mrb[96].mxu1  ;;  %v1614_v35 = vpop.f32.mrb[97].mxu0 }
 0x27e   :  { %v1838_v2 = vadd.f32 %v1837_v13, %v1612_v32  ;;  %v1839_v36 = vpop.f32.mrb[97].mxu1 }
 0x280   :  { %v2038_v44 = vadd.f32 %v3761_v60, %v1838_v2 }
 0x282   :  { %2070 = vst [vmem:[#allocation9 + $0x80] sm:$0xff] %v2038_v44  ;;  %v1617_v29 = vpop.f32.mrb[98].mxu0 }
 0x283   :  { %v1619_v42 = vpop.f32.mrb[99].mxu0 }
 0x284   :  { %v1842_v59 = vpop.f32.mrb[98].mxu1 }
 0x285   :  { %v1843_v46 = vadd.f32 %v1842_v59, %v1617_v29  ;;  %v1844_v37 = vpop.f32.mrb[99].mxu1 }
 0x287   :  { %v2039_v48 = vadd.f32 %v3761_v60, %v1843_v46 }
 0x289   :  { %2071 = vst [vmem:[#allocation9 + $0x88] sm:$0xff] %v2039_v48  ;;  %v1622_v6 = vpop.f32.mrb[100].mxu0 }
 0x28a   :  { %v1847_v25 = vpop.f32.mrb[100].mxu1  ;;  %v1624_v54 = vpop.f32.mrb[101].mxu0 }
 0x28b   :  { %v1848_v51 = vadd.f32 %v1847_v25, %v1622_v6  ;;  %v1849_v19 = vpop.f32.mrb[101].mxu1 }
 0x28d   :  { %v2040_v16 = vadd.f32 %v3761_v60, %v1848_v51 }
 0x28f   :  { %2072 = vst [vmem:[#allocation9 + $0x90] sm:$0xff] %v2040_v16  ;;  %v1627_v11 = vpop.f32.mrb[102].mxu0 }
 0x290   :  { %v1852_v30 = vpop.f32.mrb[102].mxu1  ;;  %v1629_v57 = vpop.f32.mrb[103].mxu0 }
 0x291   :  { %v1853_v52 = vadd.f32 %v1852_v30, %v1627_v11  ;;  %v1854_v21 = vpop.f32.mrb[103].mxu1 }
 0x293   :  { %v2041_v7 = vadd.f32 %v3761_v60, %v1853_v52 }
 0x295   :  { %2073 = vst [vmem:[#allocation9 + $0x98] sm:$0xff] %v2041_v7  ;;  %v1632_v5 = vpop.f32.mrb[104].mxu0 }
 0x296   :  { %v1857_v58 = vpop.f32.mrb[104].mxu1  ;;  %v1634_v56 = vpop.f32.mrb[105].mxu0 }
 0x297   :  { %v1858_v62 = vadd.f32 %v1857_v58, %v1632_v5  ;;  %v1859_v50 = vpop.f32.mrb[105].mxu1 }
 0x299   :  { %v2042_v61 = vadd.f32 %v3761_v60, %v1858_v62 }
 0x29b   :  { %2074 = vst [vmem:[#allocation9 + $0xa0] sm:$0xff] %v2042_v61  ;;  %v1637_v41 = vpop.f32.mrb[106].mxu0 }
 0x29c   :  { %v1862_v55 = vpop.f32.mrb[106].mxu1  ;;  %v1639_v10 = vpop.f32.mrb[107].mxu0 }
 0x29d   :  { %v1863_v43 = vadd.f32 %v1862_v55, %v1637_v41  ;;  %v1864_v38 = vpop.f32.mrb[107].mxu1 }
 0x29f   :  { %v2043_v23 = vadd.f32 %v3761_v60, %v1863_v43 }
 0x2a1   :  { %2075 = vst [vmem:[#allocation9 + $0xa8] sm:$0xff] %v2043_v23  ;;  %v1642_v28 = vpop.f32.mrb[108].mxu0 }
 0x2a2   :  { %v1867_v53 = vpop.f32.mrb[108].mxu1  ;;  %v1644_v27 = vpop.f32.mrb[109].mxu0 }
 0x2a3   :  { %v1868_v20 = vadd.f32 %v1867_v53, %v1642_v28  ;;  %v1869_v15 = vpop.f32.mrb[109].mxu1 }
 0x2a5   :  { %v2044_v9 = vadd.f32 %v3761_v60, %v1868_v20 }
 0x2a7   :  { %2076 = vst [vmem:[#allocation9 + $0xb0] sm:$0xff] %v2044_v9  ;;  %v1647_v34 = vpop.f32.mrb[110].mxu0 }
 0x2a8   :  { %v1872_v0 = vpop.f32.mrb[110].mxu1  ;;  %v1649_v45 = vpop.f32.mrb[111].mxu0 }
 0x2a9   :  { %v1873_v14 = vadd.f32 %v1872_v0, %v1647_v34  ;;  %v1874_v26 = vpop.f32.mrb[111].mxu1 }
 0x2ab   :  { %v2045_v17 = vadd.f32 %v3761_v60, %v1873_v14 }
 0x2ad   :  { %2077 = vst [vmem:[#allocation9 + $0xb8] sm:$0xff] %v2045_v17  ;;  %v1652_v8 = vpop.f32.mrb[112].mxu0 }
 0x2ae   :  { %v1877_v1 = vpop.f32.mrb[112].mxu1  ;;  %v1654_v4 = vpop.f32.mrb[113].mxu0 }
 0x2af   :  { %v1878_v63 = vadd.f32 %v1877_v1, %v1652_v8  ;;  %v1879_v24 = vpop.f32.mrb[113].mxu1 }
 0x2b1   :  { %v2046_v22 = vadd.f32 %v3761_v60, %v1878_v63 }
 0x2b3   :  { %2078 = vst [vmem:[#allocation9 + $0xc0] sm:$0xff] %v2046_v22  ;;  %v1657_v31 = vpop.f32.mrb[114].mxu0  ;;  %v1882_v3 = vpop.f32.mrb[114].mxu1 }
 0x2b4   :  { %v1659_v47 = vpop.f32.mrb[115].mxu0  ;;  %v1883_v12 = vadd.f32 %v1882_v3, %v1657_v31  ;;  %v1884_v39 = vpop.f32.mrb[115].mxu1 }
 0x2b6   :  { %v2047_v18 = vadd.f32 %v3761_v60, %v1883_v12 }
 0x2b8   :  { %2079 = vst [vmem:[#allocation9 + $0xc8] sm:$0xff] %v2047_v18 }
 0x2b9   :  { %v1662_v33 = vpop.f32.mrb[116].mxu0  ;;  %v1887_v49 = vpop.f32.mrb[116].mxu1 }
 0x2ba   :  { %v1664_v40 = vpop.f32.mrb[117].mxu0  ;;  %v1888_v32 = vadd.f32 %v1887_v49, %v1662_v33  ;;  %v1889_v13 = vpop.f32.mrb[117].mxu1 }
 0x2bc   :  { %v2048_v35 = vadd.f32 %v3761_v60, %v1888_v32 }
 0x2bd   :  { %v1667_v2 = vpop.f32.mrb[118].mxu0 }
 0x2be   :  { %v1892_v36 = vpop.f32.mrb[118].mxu1  ;;  %v1669_v44 = vpop.f32.mrb[119].mxu0  ;;  %2080 = vst [vmem:[#allocation9 + $0xd0] sm:$0xff] %v2048_v35 }
 0x2bf   :  { %v1893_v29 = vadd.f32 %v1892_v36, %v1667_v2  ;;  %v1894_v59 = vpop.f32.mrb[119].mxu1 }
 0x2c1   :  { %v2049_v42 = vadd.f32 %v3761_v60, %v1893_v29  ;;  %v1672_v46 = vpop.f32.mrb[120].mxu0 }
 0x2c2   :  { %v1897_v37 = vpop.f32.mrb[120].mxu1  ;;  %v1674_v48 = vpop.f32.mrb[121].mxu0 }
 0x2c3   :  { %2081 = vst [vmem:[#allocation9 + $0xd8] sm:$0xff] %v2049_v42  ;;  %v1898_v6 = vadd.f32 %v1897_v37, %v1672_v46  ;;  %v1899_v25 = vpop.f32.mrb[121].mxu1 }
 0x2c5   :  { %v2050_v54 = vadd.f32 %v3761_v60, %v1898_v6  ;;  %v1677_v51 = vpop.f32.mrb[122].mxu0 }
 0x2c6   :  { %v1902_v19 = vpop.f32.mrb[122].mxu1  ;;  %v1679_v16 = vpop.f32.mrb[123].mxu0 }
 0x2c7   :  { %2082 = vst [vmem:[#allocation9 + $0xe0] sm:$0xff] %v2050_v54  ;;  %v1903_v11 = vadd.f32 %v1902_v19, %v1677_v51  ;;  %v1904_v30 = vpop.f32.mrb[123].mxu1 }
 0x2c9   :  { %v2051_v57 = vadd.f32 %v3761_v60, %v1903_v11  ;;  %v1682_v52 = vpop.f32.mrb[124].mxu0 }
 0x2ca   :  { %v1907_v21 = vpop.f32.mrb[124].mxu1  ;;  %v1684_v7 = vpop.f32.mrb[125].mxu0 }
 0x2cb   :  { %2083 = vst [vmem:[#allocation9 + $0xe8] sm:$0xff] %v2051_v57  ;;  %v1908_v5 = vadd.f32 %v1907_v21, %v1682_v52  ;;  %v1909_v58 = vpop.f32.mrb[125].mxu1 }
 0x2cd   :  { %v2052_v56 = vadd.f32 %v3761_v60, %v1908_v5  ;;  %v1687_v62 = vpop.f32.mrb[126].mxu0 }
 0x2ce   :  { %v1912_v50 = vpop.f32.mrb[126].mxu1  ;;  %v1689_v61 = vpop.f32.mrb[127].mxu0 }
 0x2cf   :  { %2084 = vst [vmem:[#allocation9 + $0xf0] sm:$0xff] %v2052_v56  ;;  %v1913_v41 = vadd.f32 %v1912_v50, %v1687_v62  ;;  %v1914_v55 = vpop.f32.mrb[127].mxu1 }
 0x2d1   :  { %v2053_v10 = vadd.f32 %v3761_v60, %v1913_v41 }
 0x2d3   :  { %2085 = vst [vmem:[#allocation9 + $0xf8] sm:$0xff] %v2053_v10 }
 0x2d4   :  { %2608 = shalt.err (!%p2605_p0)
}
 0x2d5   :  { %s2609_s12 = scalar_lea.hbm %s3815_s5, 4096 }
 0x2d6   :  { %p2610_p1 = scmp.ne.s32.totalorder %s3815_s5, %s2609_s12  ;;  %p2613_p2 = scmp.lt.u32.totalorder %s2609_s12, %s3815_s5 }
 0x2d8   :  { %p2615_p3 = pnand %p2613_p2, %p2610_p1 }
 0x2da   :  { %2618 = shalt.err (!%p2615_p3)
}
 0x2db   :  { %2097 = dma.vmem_to_hbm [thread:$0]  %s2092_s8, 4096, %s3815_s5, [#allocation5], %s2629_s1, %s2629_s1, %s2630_s17  }
 0x2dc   :  { %2623 = dma.done.wait [#allocation5], 4096  }
 0x2dd   :  { %2624 = vsyncadd [#allocation5], 4294963200 }
 0x2de   :  { %2101 = vsyncpa [#allocation4], 1 }
 0x2df   :  { %2102 = vsyncpa [#allocation7], 1 }
 0x2e0   :  { %2103 = vsyncpa [#allocation5], 1 }

</bundles_post_ra>
